<compile_context>
chip_gen: v6e
topology: v6e:2x2x1
jax: 0.10.0
libtpu: 0.0.40
codegen_flags: <defaults>
</compile_context>

<pallas_src>
import jax
import jax.numpy as jnp
from jax.experimental import pallas as pl
from jax.experimental.pallas import tpu as pltpu

BN_EPS = 1e-5
_PREC = jax.lax.Precision.HIGHEST


# ------------------------------ fused kernel ------------------------------ #

def down_layer_kernel(xw_ref, w1_ref, s1_ref, b1_ref, w2_ref, s2_ref, b2_ref,
                      o_ref, pad1_ref, pad2_ref):
    # xw_ref  : (1, H/2, 2, W/2, 2*Cin)  input, 2x2 pool window split as
    #                                    (row-pair axis, col-pair folded into lanes)
    # w1_ref  : (9*Cin,  Cmid)           conv1 weights, im2col layout
    # w2_ref  : (9*Cmid, Cout)           conv2 weights, im2col layout
    # s*_ref  : (1, C)   folded BN scale = gamma / sqrt(var + eps)
    # b*_ref  : (1, C)   folded shift    = (bias - mean) * scale + beta
    # o_ref   : (1, H/2, W/2, Cout)
    # pad1/2  : VMEM scratch holding zero-padded (SAME) conv inputs
    _, h2, w2, cout = o_ref.shape
    cin = pad1_ref.shape[-1]
    cmid = pad2_ref.shape[-1]
    m = h2 * w2

    # ---- fused 2x2 / stride-2 max pool ------------------------------------
    xw = xw_ref[0]                                   # (h2, 2, w2, 2*cin)
    xh = jnp.max(xw, axis=1)                         # row-pair max (leading dim)
    pooled = jnp.maximum(xh[:, :, :cin],             # col-pair max: even-w lanes
                         xh[:, :, cin:])             #               vs odd-w lanes

    # ---- SAME zero padding in VMEM (no HBM roundtrip) ----------------------
    pad1_ref[...] = jnp.zeros_like(pad1_ref)
    pad1_ref[1:h2 + 1, 1:w2 + 1, :] = pooled.astype(jnp.float32)

    def conv3x3_bn_relu(pad_ref, w_ref, s_ref, b_ref, c_in):
        # im2col: (m, 9*c_in) patch matrix, then ONE MXU matmul.
        cols = [pad_ref[ky:ky + h2, kx:kx + w2, :].reshape(m, c_in)
                for ky in range(3) for kx in range(3)]
        patches = jnp.concatenate(cols, axis=-1)                  # (m, 9*c_in)
        acc = jnp.dot(patches, w_ref[...],
                      preferred_element_type=jnp.float32,
                      precision=_PREC)                            # (m, c_out)
        return jnp.maximum(acc * s_ref[...] + b_ref[...], 0.0)    # BN + ReLU

    y1 = conv3x3_bn_relu(pad1_ref, w1_ref, s1_ref, b1_ref, cin)   # (m, cmid)
    pad2_ref[...] = jnp.zeros_like(pad2_ref)
    pad2_ref[1:h2 + 1, 1:w2 + 1, :] = y1.reshape(h2, w2, cmid)    # stays in VMEM

    y2 = conv3x3_bn_relu(pad2_ref, w2_ref, s2_ref, b2_ref, cmid)  # (m, cout)
    o_ref[...] = y2.reshape(1, h2, w2, cout).astype(o_ref.dtype)


# ------------------------------ wrapper ------------------------------------ #

def down_layer_forward(x_nchw, params):
    """DownLayer.forward: maxpool(2,2) -> [conv3x3+BN+ReLU] x 2.  NCHW in/out."""
    x = jnp.transpose(x_nchw, (0, 2, 3, 1))           # NCHW -> NHWC (lane = C)
    n, h, w, cin = x.shape
    h2, w2 = h // 2, w // 2
    x = x[:, :2 * h2, :2 * w2, :]                     # MaxPool2d floor behaviour
    # Expose 2x2 windows: rows split out, column pair folded into the lane dim.
    # Pure row-major regroup -> free (metadata-only) reshape in XLA.
    xw = x.reshape(n, h2, 2, w2, 2 * cin)

    p1, p2 = params["conv1"], params["conv2"]
    cmid, cout = p1["w"].shape[-1], p2["w"].shape[-1]

    def fold_bn(p):
        scale = p["gamma"] / jnp.sqrt(p["var"] + BN_EPS)
        shift = (p["bias"] - p["mean"]) * scale + p["beta"]
        return (scale.reshape(1, -1).astype(jnp.float32),
                shift.reshape(1, -1).astype(jnp.float32))

    s1, b1 = fold_bn(p1)
    s2, b2 = fold_bn(p2)
    w1 = p1["w"].reshape(9 * cin, cmid)               # im2col weight layout
    w2m = p2["w"].reshape(9 * cmid, cout)

    out = pl.pallas_call(
        down_layer_kernel,
        out_shape=jax.ShapeDtypeStruct((n, h2, w2, cout), x.dtype),
        grid=(n,),
        in_specs=[
            pl.BlockSpec((1, h2, 2, w2, 2 * cin), lambda i: (i, 0, 0, 0, 0)),
            pl.BlockSpec((9 * cin, cmid), lambda i: (0, 0)),
            pl.BlockSpec((1, cmid), lambda i: (0, 0)),
            pl.BlockSpec((1, cmid), lambda i: (0, 0)),
            pl.BlockSpec((9 * cmid, cout), lambda i: (0, 0)),
            pl.BlockSpec((1, cout), lambda i: (0, 0)),
            pl.BlockSpec((1, cout), lambda i: (0, 0)),
        ],
        out_specs=pl.BlockSpec((1, h2, w2, cout), lambda i: (i, 0, 0, 0)),
        scratch_shapes=[
            pltpu.VMEM((h2 + 2, w2 + 2, cin), jnp.float32),   # padded pooled x
            pltpu.VMEM((h2 + 2, w2 + 2, cmid), jnp.float32),  # padded conv1 out
        ],
        compiler_params=pltpu.CompilerParams(
            dimension_semantics=("parallel",)),               # v7x: 1 image / TC
    )(xw, w1, s1, b1, w2m, s2, b2)

    return jnp.transpose(out, (0, 3, 1, 2))           # NHWC -> NCHW


# ------------------------------ params & reference ------------------------- #

def init_params(key, in_ch, out_ch):
    keys = jax.random.split(key, 12)

    def conv_block(ks, cin, cout):
        k_w, k_b, k_g, k_be, k_m, k_v = ks
        bound = 1.0 / jnp.sqrt(float(cin * 9))
        return dict(
            w=jax.random.uniform(k_w, (3, 3, cin, cout), jnp.float32, -bound, bound),
            bias=jax.random.uniform(k_b, (cout,), jnp.float32, -bound, bound),
            gamma=1.0 + 0.1 * jax.random.normal(k_g, (cout,), jnp.float32),
            beta=0.1 * jax.random.normal(k_be, (cout,), jnp.float32),
            mean=0.1 * jax.random.normal(k_m, (cout,), jnp.float32),
            var=jnp.abs(1.0 + 0.1 * jax.random.normal(k_v, (cout,), jnp.float32)),
        )

    return dict(conv1=conv_block(keys[:6], in_ch, out_ch),
                conv2=conv_block(keys[6:], out_ch, out_ch))


def reference(x_nchw, params):
    """Pure-JAX reference (same eval-mode semantics) for validation."""
    x = jnp.transpose(x_nchw, (0, 2, 3, 1))
    x = jax.lax.reduce_window(x, -jnp.inf, jax.lax.max,
                              (1, 2, 2, 1), (1, 2, 2, 1), "VALID")
    for name in ("conv1", "conv2"):
        p = params[name]
        y = jax.lax.conv_general_dilated(
            x, p["w"], (1, 1), "SAME",
            dimension_numbers=("NHWC", "HWIO", "NHWC"),
            precision=_PREC) + p["bias"]
        y = (y - p["mean"]) / jnp.sqrt(p["var"] + BN_EPS) * p["gamma"] + p["beta"]
        x = jnp.maximum(y, 0.0)
    return jnp.transpose(x, (0, 3, 1, 2))


# ------------------------------ main ---------------------------------------- #

if __name__ == "__main__":
    key = jax.random.PRNGKey(0)
    k_x, k_p = jax.random.split(key)

    batch, in_ch, out_ch, spatial = 2, 4, 8, 16
    x = jax.random.normal(k_x, (batch, in_ch, spatial, spatial), jnp.float32)
    params = init_params(k_p, in_ch, out_ch)

    # Make MXU inputs bf16-exact so the comparison is insensitive to the
    # hardware matmul pass count (purely a test robustness measure).
    x = x.astype(jnp.bfloat16).astype(jnp.float32)
    for blk in params.values():
        blk["w"] = blk["w"].astype(jnp.bfloat16).astype(jnp.float32)

    out = jax.block_until_ready(down_layer_forward(x, params))
    ref = reference(x, params)

    assert out.shape == (batch, out_ch, spatial // 2, spatial // 2), out.shape
    max_err = float(jnp.max(jnp.abs(out - ref)))
    assert max_err < 1e-3, f"mismatch vs reference: {max_err}"
    print("KERNEL_OK")
</pallas_src>

<mosaic_0001>
module attributes {stable_mosaic.version = 11 : i64} {
  func.func @down_layer_kernel(%arg0: i32, %arg1: memref<1x8x2x8x8xf32, #tpu.memory_space<vmem>>, %arg2: memref<36x8xf32, #tpu.memory_space<vmem>>, %arg3: memref<1x8xf32, #tpu.memory_space<vmem>>, %arg4: memref<1x8xf32, #tpu.memory_space<vmem>>, %arg5: memref<72x8xf32, #tpu.memory_space<vmem>>, %arg6: memref<1x8xf32, #tpu.memory_space<vmem>>, %arg7: memref<1x8xf32, #tpu.memory_space<vmem>>, %arg8: memref<1x8x8x8xf32, #tpu.memory_space<vmem>>, %arg9: memref<10x10x4xf32, #tpu.memory_space<vmem>>, %arg10: memref<10x10x8xf32, #tpu.memory_space<vmem>>) attributes {dimension_semantics = [#tpu.dimension_semantics<parallel>], iteration_bounds = array<i64: 2>, scalar_prefetch = 0 : i64, scratch_operands = 2 : i64, tpu.core_type = #tpu.core_type<tc>, window_params = [{transform_indices = @transform_0, window_bounds = array<i64: 1, 8, 2, 8, 8>}, {pipeline_mode = #tpu.pipeline_mode<synchronous>, transform_indices = @transform_1, window_bounds = array<i64: 36, 8>}, {pipeline_mode = #tpu.pipeline_mode<synchronous>, transform_indices = @transform_2, window_bounds = array<i64: 1, 8>}, {pipeline_mode = #tpu.pipeline_mode<synchronous>, transform_indices = @transform_3, window_bounds = array<i64: 1, 8>}, {pipeline_mode = #tpu.pipeline_mode<synchronous>, transform_indices = @transform_4, window_bounds = array<i64: 72, 8>}, {pipeline_mode = #tpu.pipeline_mode<synchronous>, transform_indices = @transform_5, window_bounds = array<i64: 1, 8>}, {pipeline_mode = #tpu.pipeline_mode<synchronous>, transform_indices = @transform_6, window_bounds = array<i64: 1, 8>}, {transform_indices = @transform_7, window_bounds = array<i64: 1, 8, 8, 8>}]} {
    %c0 = arith.constant 0 : index
    %c0_0 = arith.constant 0 : index
    %c0_1 = arith.constant 0 : index
    %c0_2 = arith.constant 0 : index
    %c0_3 = arith.constant 0 : index
    %0 = vector.load %arg1[%c0, %c0_0, %c0_1, %c0_2, %c0_3] : memref<1x8x2x8x8xf32, #tpu.memory_space<vmem>>, vector<1x8x2x8x8xf32>
    %1 = vector.shape_cast %0 : vector<1x8x2x8x8xf32> to vector<8x2x8x8xf32>
    %cst = arith.constant dense<0xFF800000> : vector<8x8x8xf32>
    %2 = vector.multi_reduction <maximumf>, %1, %cst [1] : vector<8x2x8x8xf32> to vector<8x8x8xf32>
    %3 = vector.extract_strided_slice %2 {offsets = [0, 0, 0], sizes = [8, 8, 4], strides = [1, 1, 1]} : vector<8x8x8xf32> to vector<8x8x4xf32>
    %4 = vector.extract_strided_slice %2 {offsets = [0, 0, 4], sizes = [8, 8, 4], strides = [1, 1, 1]} : vector<8x8x8xf32> to vector<8x8x4xf32>
    %5 = arith.maximumf %3, %4 : vector<8x8x4xf32>
    %cst_4 = arith.constant 0.000000e+00 : f32
    %6 = vector.broadcast %cst_4 : f32 to vector<10x10x4xf32>
    %c0_5 = arith.constant 0 : index
    %c0_6 = arith.constant 0 : index
    %c0_7 = arith.constant 0 : index
    %7 = vector.load %arg9[%c0_5, %c0_6, %c0_7] : memref<10x10x4xf32, #tpu.memory_space<vmem>>, vector<10x10x4xf32>
    tpu.vector_store %arg9[%c0_5, %c0_6, %c0_7], %6 {strides = array<i32>} : memref<10x10x4xf32, #tpu.memory_space<vmem>>, vector<10x10x4xf32>,
    %c1 = arith.constant 1 : index
    %c1_8 = arith.constant 1 : index
    %c0_9 = arith.constant 0 : index
    %8 = vector.load %arg9[%c1, %c1_8, %c0_9] : memref<10x10x4xf32, #tpu.memory_space<vmem>>, vector<8x8x4xf32>
    tpu.vector_store %arg9[%c1, %c1_8, %c0_9], %5 {strides = array<i32>} : memref<10x10x4xf32, #tpu.memory_space<vmem>>, vector<8x8x4xf32>,
    %c0_10 = arith.constant 0 : index
    %c0_11 = arith.constant 0 : index
    %c0_12 = arith.constant 0 : index
    %9 = vector.load %arg9[%c0_10, %c0_11, %c0_12] : memref<10x10x4xf32, #tpu.memory_space<vmem>>, vector<8x8x4xf32>
    %10 = vector.shape_cast %9 : vector<8x8x4xf32> to vector<64x4xf32>
    %c0_13 = arith.constant 0 : index
    %c1_14 = arith.constant 1 : index
    %c0_15 = arith.constant 0 : index
    %11 = vector.load %arg9[%c0_13, %c1_14, %c0_15] : memref<10x10x4xf32, #tpu.memory_space<vmem>>, vector<8x8x4xf32>
    %12 = vector.shape_cast %11 : vector<8x8x4xf32> to vector<64x4xf32>
    %c0_16 = arith.constant 0 : index
    %c2 = arith.constant 2 : index
    %c0_17 = arith.constant 0 : index
    %13 = vector.load %arg9[%c0_16, %c2, %c0_17] : memref<10x10x4xf32, #tpu.memory_space<vmem>>, vector<8x8x4xf32>
    %14 = vector.shape_cast %13 : vector<8x8x4xf32> to vector<64x4xf32>
    %c1_18 = arith.constant 1 : index
    %c0_19 = arith.constant 0 : index
    %c0_20 = arith.constant 0 : index
    %15 = vector.load %arg9[%c1_18, %c0_19, %c0_20] : memref<10x10x4xf32, #tpu.memory_space<vmem>>, vector<8x8x4xf32>
    %16 = vector.shape_cast %15 : vector<8x8x4xf32> to vector<64x4xf32>
    %c1_21 = arith.constant 1 : index
    %c1_22 = arith.constant 1 : index
    %c0_23 = arith.constant 0 : index
    %17 = vector.load %arg9[%c1_21, %c1_22, %c0_23] : memref<10x10x4xf32, #tpu.memory_space<vmem>>, vector<8x8x4xf32>
    %18 = vector.shape_cast %17 : vector<8x8x4xf32> to vector<64x4xf32>
    %c1_24 = arith.constant 1 : index
    %c2_25 = arith.constant 2 : index
    %c0_26 = arith.constant 0 : index
    %19 = vector.load %arg9[%c1_24, %c2_25, %c0_26] : memref<10x10x4xf32, #tpu.memory_space<vmem>>, vector<8x8x4xf32>
    %20 = vector.shape_cast %19 : vector<8x8x4xf32> to vector<64x4xf32>
    %c2_27 = arith.constant 2 : index
    %c0_28 = arith.constant 0 : index
    %c0_29 = arith.constant 0 : index
    %21 = vector.load %arg9[%c2_27, %c0_28, %c0_29] : memref<10x10x4xf32, #tpu.memory_space<vmem>>, vector<8x8x4xf32>
    %22 = vector.shape_cast %21 : vector<8x8x4xf32> to vector<64x4xf32>
    %c2_30 = arith.constant 2 : index
    %c1_31 = arith.constant 1 : index
    %c0_32 = arith.constant 0 : index
    %23 = vector.load %arg9[%c2_30, %c1_31, %c0_32] : memref<10x10x4xf32, #tpu.memory_space<vmem>>, vector<8x8x4xf32>
    %24 = vector.shape_cast %23 : vector<8x8x4xf32> to vector<64x4xf32>
    %c2_33 = arith.constant 2 : index
    %c2_34 = arith.constant 2 : index
    %c0_35 = arith.constant 0 : index
    %25 = vector.load %arg9[%c2_33, %c2_34, %c0_35] : memref<10x10x4xf32, #tpu.memory_space<vmem>>, vector<8x8x4xf32>
    %26 = vector.shape_cast %25 : vector<8x8x4xf32> to vector<64x4xf32>
    %27 = tpu.concatenate %10, %12, %14, %16, %18, %20, %22, %24, %26 in 1 : vector<64x4xf32>, vector<64x4xf32>, vector<64x4xf32>, vector<64x4xf32>, vector<64x4xf32>, vector<64x4xf32>, vector<64x4xf32>, vector<64x4xf32>, vector<64x4xf32> -> vector<64x36xf32>
    %c0_36 = arith.constant 0 : index
    %c0_37 = arith.constant 0 : index
    %28 = vector.load %arg2[%c0_36, %c0_37] : memref<36x8xf32, #tpu.memory_space<vmem>>, vector<36x8xf32>
    %cst_38 = arith.constant dense<0.000000e+00> : vector<64x8xf32>
    %29 = tpu.matmul %27, %28, %cst_38 {dimension_numbers = #tpu.dot_dimension_numbers<[1], [0], [0], [1], [0, 0, 1, 1], [], []>, precision = #tpu.contract_precision<fp32>} : vector<64x36xf32>, vector<36x8xf32>, vector<64x8xf32> -> vector<64x8xf32>
    %c0_39 = arith.constant 0 : index
    %c0_40 = arith.constant 0 : index
    %30 = vector.load %arg3[%c0_39, %c0_40] : memref<1x8xf32, #tpu.memory_space<vmem>>, vector<1x8xf32>
    %31 = vector.broadcast %30 : vector<1x8xf32> to vector<64x8xf32>
    %32 = arith.mulf %29, %31 : vector<64x8xf32>
    %c0_41 = arith.constant 0 : index
    %c0_42 = arith.constant 0 : index
    %33 = vector.load %arg4[%c0_41, %c0_42] : memref<1x8xf32, #tpu.memory_space<vmem>>, vector<1x8xf32>
    %34 = vector.broadcast %33 : vector<1x8xf32> to vector<64x8xf32>
    %35 = arith.addf %32, %34 : vector<64x8xf32>
    %cst_43 = arith.constant 0.000000e+00 : f32
    %36 = vector.broadcast %cst_43 : f32 to vector<64x8xf32>
    %37 = arith.maximumf %35, %36 : vector<64x8xf32>
    %cst_44 = arith.constant 0.000000e+00 : f32
    %38 = vector.broadcast %cst_44 : f32 to vector<10x10x8xf32>
    %c0_45 = arith.constant 0 : index
    %c0_46 = arith.constant 0 : index
    %c0_47 = arith.constant 0 : index
    %39 = vector.load %arg10[%c0_45, %c0_46, %c0_47] : memref<10x10x8xf32, #tpu.memory_space<vmem>>, vector<10x10x8xf32>
    tpu.vector_store %arg10[%c0_45, %c0_46, %c0_47], %38 {strides = array<i32>} : memref<10x10x8xf32, #tpu.memory_space<vmem>>, vector<10x10x8xf32>,
    %40 = vector.shape_cast %37 : vector<64x8xf32> to vector<8x8x8xf32>
    %c1_48 = arith.constant 1 : index
    %c1_49 = arith.constant 1 : index
    %c0_50 = arith.constant 0 : index
    %41 = vector.load %arg10[%c1_48, %c1_49, %c0_50] : memref<10x10x8xf32, #tpu.memory_space<vmem>>, vector<8x8x8xf32>
    tpu.vector_store %arg10[%c1_48, %c1_49, %c0_50], %40 {strides = array<i32>} : memref<10x10x8xf32, #tpu.memory_space<vmem>>, vector<8x8x8xf32>,
    %c0_51 = arith.constant 0 : index
    %c0_52 = arith.constant 0 : index
    %c0_53 = arith.constant 0 : index
    %42 = vector.load %arg10[%c0_51, %c0_52, %c0_53] : memref<10x10x8xf32, #tpu.memory_space<vmem>>, vector<8x8x8xf32>
    %43 = vector.shape_cast %42 : vector<8x8x8xf32> to vector<64x8xf32>
    %c0_54 = arith.constant 0 : index
    %c1_55 = arith.constant 1 : index
    %c0_56 = arith.constant 0 : index
    %44 = vector.load %arg10[%c0_54, %c1_55, %c0_56] : memref<10x10x8xf32, #tpu.memory_space<vmem>>, vector<8x8x8xf32>
    %45 = vector.shape_cast %44 : vector<8x8x8xf32> to vector<64x8xf32>
    %c0_57 = arith.constant 0 : index
    %c2_58 = arith.constant 2 : index
    %c0_59 = arith.constant 0 : index
    %46 = vector.load %arg10[%c0_57, %c2_58, %c0_59] : memref<10x10x8xf32, #tpu.memory_space<vmem>>, vector<8x8x8xf32>
    %47 = vector.shape_cast %46 : vector<8x8x8xf32> to vector<64x8xf32>
    %c1_60 = arith.constant 1 : index
    %c0_61 = arith.constant 0 : index
    %c0_62 = arith.constant 0 : index
    %48 = vector.load %arg10[%c1_60, %c0_61, %c0_62] : memref<10x10x8xf32, #tpu.memory_space<vmem>>, vector<8x8x8xf32>
    %49 = vector.shape_cast %48 : vector<8x8x8xf32> to vector<64x8xf32>
    %c1_63 = arith.constant 1 : index
    %c1_64 = arith.constant 1 : index
    %c0_65 = arith.constant 0 : index
    %50 = vector.load %arg10[%c1_63, %c1_64, %c0_65] : memref<10x10x8xf32, #tpu.memory_space<vmem>>, vector<8x8x8xf32>
    %51 = vector.shape_cast %50 : vector<8x8x8xf32> to vector<64x8xf32>
    %c1_66 = arith.constant 1 : index
    %c2_67 = arith.constant 2 : index
    %c0_68 = arith.constant 0 : index
    %52 = vector.load %arg10[%c1_66, %c2_67, %c0_68] : memref<10x10x8xf32, #tpu.memory_space<vmem>>, vector<8x8x8xf32>
    %53 = vector.shape_cast %52 : vector<8x8x8xf32> to vector<64x8xf32>
    %c2_69 = arith.constant 2 : index
    %c0_70 = arith.constant 0 : index
    %c0_71 = arith.constant 0 : index
    %54 = vector.load %arg10[%c2_69, %c0_70, %c0_71] : memref<10x10x8xf32, #tpu.memory_space<vmem>>, vector<8x8x8xf32>
    %55 = vector.shape_cast %54 : vector<8x8x8xf32> to vector<64x8xf32>
    %c2_72 = arith.constant 2 : index
    %c1_73 = arith.constant 1 : index
    %c0_74 = arith.constant 0 : index
    %56 = vector.load %arg10[%c2_72, %c1_73, %c0_74] : memref<10x10x8xf32, #tpu.memory_space<vmem>>, vector<8x8x8xf32>
    %57 = vector.shape_cast %56 : vector<8x8x8xf32> to vector<64x8xf32>
    %c2_75 = arith.constant 2 : index
    %c2_76 = arith.constant 2 : index
    %c0_77 = arith.constant 0 : index
    %58 = vector.load %arg10[%c2_75, %c2_76, %c0_77] : memref<10x10x8xf32, #tpu.memory_space<vmem>>, vector<8x8x8xf32>
    %59 = vector.shape_cast %58 : vector<8x8x8xf32> to vector<64x8xf32>
    %60 = tpu.concatenate %43, %45, %47, %49, %51, %53, %55, %57, %59 in 1 : vector<64x8xf32>, vector<64x8xf32>, vector<64x8xf32>, vector<64x8xf32>, vector<64x8xf32>, vector<64x8xf32>, vector<64x8xf32>, vector<64x8xf32>, vector<64x8xf32> -> vector<64x72xf32>
    %c0_78 = arith.constant 0 : index
    %c0_79 = arith.constant 0 : index
    %61 = vector.load %arg5[%c0_78, %c0_79] : memref<72x8xf32, #tpu.memory_space<vmem>>, vector<72x8xf32>
    %cst_80 = arith.constant dense<0.000000e+00> : vector<64x8xf32>
    %62 = tpu.matmul %60, %61, %cst_80 {dimension_numbers = #tpu.dot_dimension_numbers<[1], [0], [0], [1], [0, 0, 1, 1], [], []>, precision = #tpu.contract_precision<fp32>} : vector<64x72xf32>, vector<72x8xf32>, vector<64x8xf32> -> vector<64x8xf32>
    %c0_81 = arith.constant 0 : index
    %c0_82 = arith.constant 0 : index
    %63 = vector.load %arg6[%c0_81, %c0_82] : memref<1x8xf32, #tpu.memory_space<vmem>>, vector<1x8xf32>
    %64 = vector.broadcast %63 : vector<1x8xf32> to vector<64x8xf32>
    %65 = arith.mulf %62, %64 : vector<64x8xf32>
    %c0_83 = arith.constant 0 : index
    %c0_84 = arith.constant 0 : index
    %66 = vector.load %arg7[%c0_83, %c0_84] : memref<1x8xf32, #tpu.memory_space<vmem>>, vector<1x8xf32>
    %67 = vector.broadcast %66 : vector<1x8xf32> to vector<64x8xf32>
    %68 = arith.addf %65, %67 : vector<64x8xf32>
    %cst_85 = arith.constant 0.000000e+00 : f32
    %69 = vector.broadcast %cst_85 : f32 to vector<64x8xf32>
    %70 = arith.maximumf %68, %69 : vector<64x8xf32>
    %71 = vector.shape_cast %70 : vector<64x8xf32> to vector<1x8x8x8xf32>
    %c0_86 = arith.constant 0 : index
    %c0_87 = arith.constant 0 : index
    %c0_88 = arith.constant 0 : index
    %c0_89 = arith.constant 0 : index
    %72 = vector.load %arg8[%c0_86, %c0_87, %c0_88, %c0_89] : memref<1x8x8x8xf32, #tpu.memory_space<vmem>>, vector<1x8x8x8xf32>
    tpu.vector_store %arg8[%c0_86, %c0_87, %c0_88, %c0_89], %71 {strides = array<i32>} : memref<1x8x8x8xf32, #tpu.memory_space<vmem>>, vector<1x8x8x8xf32>,
    return
  }
  func.func @transform_0(%arg0: i32) -> (i32, i32, i32, i32, i32) {
    %c0_i32 = arith.constant 0 : i32
    %c0_i32_0 = arith.constant 0 : i32
    %c0_i32_1 = arith.constant 0 : i32
    %c0_i32_2 = arith.constant 0 : i32
    %c0_i32_3 = arith.constant 0 : i32
    return %arg0, %c0_i32, %c0_i32_0, %c0_i32_1, %c0_i32_2 : i32, i32, i32, i32, i32
  }
  func.func @transform_1(%arg0: i32) -> (i32, i32) {
    %c0_i32 = arith.constant 0 : i32
    %c0_i32_0 = arith.constant 0 : i32
    %c0_i32_1 = arith.constant 0 : i32
    return %c0_i32, %c0_i32_0 : i32, i32
  }
  func.func @transform_2(%arg0: i32) -> (i32, i32) {
    %c0_i32 = arith.constant 0 : i32
    %c0_i32_0 = arith.constant 0 : i32
    %c0_i32_1 = arith.constant 0 : i32
    return %c0_i32, %c0_i32_0 : i32, i32
  }
  func.func @transform_3(%arg0: i32) -> (i32, i32) {
    %c0_i32 = arith.constant 0 : i32
    %c0_i32_0 = arith.constant 0 : i32
    %c0_i32_1 = arith.constant 0 : i32
    return %c0_i32, %c0_i32_0 : i32, i32
  }
  func.func @transform_4(%arg0: i32) -> (i32, i32) {
    %c0_i32 = arith.constant 0 : i32
    %c0_i32_0 = arith.constant 0 : i32
    %c0_i32_1 = arith.constant 0 : i32
    return %c0_i32, %c0_i32_0 : i32, i32
  }
  func.func @transform_5(%arg0: i32) -> (i32, i32) {
    %c0_i32 = arith.constant 0 : i32
    %c0_i32_0 = arith.constant 0 : i32
    %c0_i32_1 = arith.constant 0 : i32
    return %c0_i32, %c0_i32_0 : i32, i32
  }
  func.func @transform_6(%arg0: i32) -> (i32, i32) {
    %c0_i32 = arith.constant 0 : i32
    %c0_i32_0 = arith.constant 0 : i32
    %c0_i32_1 = arith.constant 0 : i32
    return %c0_i32, %c0_i32_0 : i32, i32
  }
  func.func @transform_7(%arg0: i32) -> (i32, i32, i32, i32) {
    %c0_i32 = arith.constant 0 : i32
    %c0_i32_0 = arith.constant 0 : i32
    %c0_i32_1 = arith.constant 0 : i32
    %c0_i32_2 = arith.constant 0 : i32
    return %arg0, %c0_i32, %c0_i32_0, %c0_i32_1 : i32, i32, i32, i32
  }
}

</mosaic_0001>

<bundles_post_ra>
// kernel: tpu_custom_call.1
= control target key start
LH: loop header
LB: loop body
LE: loop exit
PB: predicated region body
PF: predicated region fallthrough
CT: control target
= control target key end

     0   :  { %12 = vsyncpa [#allocation5], 0  ;;  %s5167_s0 = inlined_call_operand.hbm [shape: f32[2,8,2,8,8], index: 0, kind: input, shape index: {}]   ;;  %s5168_s1 = inlined_call_operand.vmem [shape: f32[36,8], index: 1, kind: input, shape index: {}]   ;;  %s5169_s2 = inlined_call_operand.vmem [shape: f32[1,8], index: 2, kind: input, shape index: {}]   ;;  %s5170_s3 = inlined_call_operand.vmem [shape: f32[1,8], index: 3, kind: input, shape index: {}]   ;;  %s5171_s4 = inlined_call_operand.vmem [shape: f32[72,8], index: 4, kind: input, shape index: {}]   ;;  %s5172_s5 = inlined_call_operand.vmem [shape: f32[1,8], index: 5, kind: input, shape index: {}]   ;;  %s5173_s6 = inlined_call_operand.vmem [shape: f32[1,8], index: 6, kind: input, shape index: {}]   ;;  %s5174_s7 = inlined_call_operand.hbm [shape: f32[2,8,8,8], index: 7, kind: output, shape index: {}]  }
   0x1   :  { %14 = vsyncpa [#allocation5 + $0x1], 0 }
   0x2   :  { %15 = vsyncpa [#allocation6], 0 }
   0x3   :  { %17 = vsyncpa [#allocation6 + $0x1], 0  ;;  %s3852_s24 = smov 0   ;;  %s3854_s25 = smov 0  }
   0x4   :  { %s3856_s26 = smov 0   ;;  %s3858_s27 = smov 0  }
   0x5 LB: > { %s3873_s28 = sadd.s32 4294967295, %s3791_s27   ;;  %s3124_s29 = sadd.s32 4294967294, %s3791_s27   ;;  %s3791_s27 = sphi %s3858_s27, %s5189_s27   ;;  %s3787_s26 = sphi %s3856_s26, %s5188_s26   ;;  %s3783_s25 = sphi %s3854_s25, %s5187_s25   ;;  %s3779_s24 = sphi %s3852_s24, %s5186_s24  }
   0x6   : > { %s3877_s30 = sadd.s32 1, %s3791_s27   ;;  %s30_s8 = sadd.s32 1, %s3787_s26 }
   0x7   : > { %s27_s9 = ssub.s32 %s3791_s27, %s3877_s30  ;;  %p37_p0 = scmp.ne.s32.totalorder %s3787_s26, %s3783_s25 }
   0x8   : > { %p28_p1 = scmp.eq.s32.totalorder %s27_s9, 0  ;;  %p38_p2 = scmp.eq.s32.totalorder %s3791_s27, 0 }
   0x9   : > { %p43_p3 = scmp.ne.s32.totalorder %s3783_s25, %s3779_s24  ;;  %p44_p4 = scmp.eq.s32.totalorder %s3873_s28, 0 }
   0xa   : > { %s3889_s10 = scalar_select %p28_p1, %s3787_s26, %s30_s8  }
   0xb   : > { %p3891_p5 = por %p38_p2, %p37_p0  ;;  %p3895_p6 = por %p44_p4, %p43_p3 }
   0xc   : > { %p193_p7 = scmp.eq.s32.totalorder %s3873_s28, 1  ;;  %p199_p8 = scmp.eq.s32.totalorder %s3124_s29, 1 }
   0xd   : > { %s5178_s12 = scalar_select %p3895_p6, 1, 0 }
   0xe   : > { %p3648_p10 = scmp.lt.s32.totalorder %s3791_s27, 2  ;;  %p3902_p11 = por %p193_p7, %p37_p0 }
   0xf   : > { %p3906_p12 = por %p199_p8, %p43_p3  ;;  %s237_s15 = sand.u32 1, %s3787_s26  }
  0x10   : > { %s5179_s13 = scalar_select %p3902_p11, 1, 0 }
  0x11   : > { %s5180_s14 = scalar_select %p3906_p12, 1, 0 }
  0x12   : > { %s3142_s16 = sshll.u32 %s3791_s27, 11  ;;  %s3127_s17 = sshll.u32 %s237_s15, 7 }
  0x13   : > { %s3915_s20 = scalar_lea.hbm %s5167_s0, %s3142_s16  ;;  %s241_s21 = scalar_lea.vmem [#allocation4], %s3127_s17 }
  0x14   : > { %s248_s22 = sshll.u32 %s241_s21, 4  ;;  %p3919_p13 = pnand %p3648_p10, %p3891_p5  ;;  %s3923_s22 = int_to_ptr.vmem [resolvable:$true] %s248_s22 }
  0x15   : > { %s3925_s29 = scalar_lea.sflag [#allocation5], %s237_s15  ;;  %s3699_s8 = scalar_lea.hbm %s3915_s20, 2048 }
  0x16   : > { %p3700_p0 = scmp.ne.s32.totalorder %s3915_s20, %s3699_s8  ;;  %p3701_p1 = pneg %p3919_p13 }
  0x17   : > { %s3704_s17 = scalar_lea.hbm %s5167_s0, 4096  ;;  %p3705_p4 = scmp.lt.s32.totalorder %s3915_s20, %s5167_s0 }
  0x18   : > { %p3702_p2 = pnand %p3701_p1, %p3700_p0  ;;  %p3706_p5 = scmp.lt.s32.totalorder %s3704_s17, %s3699_s8 }
  0x1a   : > { %p3703_p3 = pneg %p3702_p2  ;;  %p3707_p7 = por %p3706_p5, %p3705_p4 }
  0x1c   : > { %p3708_p8 = pnand %p3707_p7, %p3703_p3 }
  0x1e   : > { %3711 = shalt.err (!%p3708_p8)
}
  0x1f   : > { %s3712_s15 = scalar_lea.vmem %s3923_s22, 2048  ;;  %s3793_s19 = smov [#allocation4]  }
  0x20   : > { %p3713_p10 = scmp.ne.s32.totalorder %s3923_s22, %s3712_s15  ;;  %s3717_s21 = sshll.u32 %s3793_s19, 4  ;;  %s3718_s21 = int_to_ptr.vmem [resolvable:$false] %s3717_s21 }
  0x21   : > { %s3719_s9 = scalar_lea.vmem %s3718_s21, 4096  ;;  %p3720_p2 = scmp.lt.s32.totalorder %s3923_s22, %s3718_s21 }
  0x22   : > { %p3715_p9 = pnand %p3713_p10, %p3701_p1  ;;  %p3721_p12 = scmp.lt.s32.totalorder %s3719_s9, %s3712_s15 }
  0x24   : > { %p3716_p0 = pneg %p3715_p9  ;;  %p3722_p11 = por %p3721_p12, %p3720_p2 }
  0x26   : > { %p3723_p6 = pnand %p3722_p11, %p3716_p0 }
  0x28   : > { %3726 = shalt.err (!%p3723_p6)
}
  0x29   : > { %s3794_s8 = smov 128   ;;  %s3795_s16 = smov 8  }
  0x2a   : > { %3643 = dma.hbm_to_vmem [thread:$0]  (!%p3919_p13), %s3915_s20, 2048, %s3923_s22, %s3925_s29, %s3794_s8, %s3794_s8, %s3795_s16  }
  0x2b   : > { %p3130_p9 = scmp.ge.s32.totalorder %s3791_s27, 1  ;;  %p256_p1 = scmp.lt.s32.totalorder %s3791_s27, 3 }
  0x2d   : > { %p257_p3 = pnand %p3130_p9, %p256_p1 }
  0x2e   : > { %s3949_s17 = sand.u32 (!%p257_p3), 1, %s3783_s25   ;;  %p5182_p6 = scmp.ne.s32.totalorder (!%p257_p3), %s5178_s12, 0 }
  0x2f   : > { %260 = sbr.rel (%p257_p3) target bundleno = 1160 (0x488), region = 48  ;;  %s3131_s11 = sshll.u32 (!%p257_p3), %s3949_s17, 7 }
  0x30   : > { %s263_s18 = scalar_lea.sflag (!%p257_p3), [#allocation5], %s3949_s17  ;;  %s3953_s15 = scalar_lea.vmem (!%p257_p3), [#allocation4], %s3131_s11 }
  0x34   : > { %3770 = dma.done.wait (%p5182_p6), %s263_s18, 2048  }
  0x35   : > { %3772 = vsyncadd (%p5182_p6), %s263_s18, 4294965248  ;;  %vm313_vm0 = vcmask 64512   ;;  %vm378_vm1 = vcmask 31744   ;;  %vm380_vm2 = vcmask 25600   ;;  %v3796_v0 = vmov 0.0   ;;  %v297_v1 = vld [vmem:[%s3953_s15] sm:$0xff] }
  0x36   : > { %379 = vst.msk [vmem:[#allocation2] sm:$0xff] %vm378_vm1, %v3796_v0  ;;  %382 = vst.msk [vmem:[#allocation2 + $0x10] sm:$0xff] %vm378_vm1, %v3796_v0  ;;  %v298_v2 = vld [vmem:[%s3953_s15 + $0x8] sm:$0xff]  ;;  %v299_v3 = vld [vmem:[%s3953_s15 + $0x10] sm:$0xff]  ;;  %v314_v4 = vsel %vm313_vm0, %v297_v1, -inf  ;;  %s3797_s12 = smov 124  }
  0x37   : > { %381 = vst.msk [vmem:[#allocation2 + $0x8] sm:$0x3] %vm380_vm2, %v3796_v0  ;;  %383 = vst.msk [vmem:[#allocation2 + $0x18] sm:$0x3] %vm380_vm2, %v3796_v0  ;;  %v315_v5 = vsel %vm313_vm0, %v298_v2, -inf  ;;  %v300_v6 = vld [vmem:[%s3953_s15 + $0x18] sm:$0xff] }
  0x38   : > { %384 = vst.msk [vmem:[#allocation2 + $0x20] sm:$0xff] %vm378_vm1, %v3796_v0  ;;  %386 = vst.msk [vmem:[#allocation2 + $0x30] sm:$0xff] %vm378_vm1, %v3796_v0  ;;  %v317_v7 = vsel %vm313_vm0, %v299_v3, -inf  ;;  %v301_v8 = vld [vmem:[%s3953_s15 + $0x20] sm:$0xff]  ;;  %v302_v9 = vld [vmem:[%s3953_s15 + $0x28] sm:$0xff]  ;;  %v316_v10 = vmax.f32 %v314_v4, %v315_v5  ;;  %v318_v11 = vsel %vm313_vm0, %v300_v6, -inf }
  0x39   : > { %385 = vst.msk [vmem:[#allocation2 + $0x28] sm:$0x3] %vm380_vm2, %v3796_v0  ;;  %387 = vst.msk [vmem:[#allocation2 + $0x38] sm:$0x3] %vm380_vm2, %v3796_v0  ;;  %v320_v12 = vsel %vm313_vm0, %v301_v8, -inf  ;;  %v321_v13 = vsel %vm313_vm0, %v302_v9, -inf  ;;  %v319_v23 = vmax.f32 %v317_v7, %v318_v11 }
  0x3a   : > { %388 = vst.msk [vmem:[#allocation2 + $0x40] sm:$0xff] %vm378_vm1, %v3796_v0  ;;  %390 = vst.msk [vmem:[#allocation2 + $0x50] sm:$0xff] %vm378_vm1, %v3796_v0  ;;  %v303_v14 = vld [vmem:[%s3953_s15 + $0x30] sm:$0xff]  ;;  %v304_v15 = vld [vmem:[%s3953_s15 + $0x38] sm:$0xff]  ;;  %v322_v17 = vmax.f32 %v320_v12, %v321_v13  ;;  %346 = vrot.lane.b32.xlu0 %v316_v10, %s3797_s12  ;;  %s3798_s20 = smov 4   ;;  %s3799_s22 = smov 24  }
  0x3b   : > { %389 = vst.msk [vmem:[#allocation2 + $0x48] sm:$0x3] %vm380_vm2, %v3796_v0  ;;  %391 = vst.msk [vmem:[#allocation2 + $0x58] sm:$0x3] %vm380_vm2, %v3796_v0  ;;  %v305_v16 = vld [vmem:[%s3953_s15 + $0x40] sm:$0xff]  ;;  %v323_v18 = vsel %vm313_vm0, %v303_v14, -inf }
  0x3c   : > { %392 = vst.msk [vmem:[#allocation2 + $0x60] sm:$0xff] %vm378_vm1, %v3796_v0  ;;  %394 = vst.msk [vmem:[#allocation2 + $0x70] sm:$0xff] %vm378_vm1, %v3796_v0  ;;  %v324_v19 = vsel %vm313_vm0, %v304_v15, -inf  ;;  %v306_v20 = vld [vmem:[%s3953_s15 + $0x48] sm:$0xff]  ;;  %v307_v21 = vld [vmem:[%s3953_s15 + $0x50] sm:$0xff]  ;;  %350 = vrot.lane.b32.xlu1 %v322_v17, %s3797_s12  ;;  %v326_v25 = vsel %vm313_vm0, %v305_v16, -inf }
  0x3d   : > { %393 = vst.msk [vmem:[#allocation2 + $0x68] sm:$0x3] %vm380_vm2, %v3796_v0  ;;  %395 = vst.msk [vmem:[#allocation2 + $0x78] sm:$0x3] %vm380_vm2, %v3796_v0  ;;  %v308_v22 = vld [vmem:[%s3953_s15 + $0x58] sm:$0xff]  ;;  %v325_v24 = vmax.f32 %v323_v18, %v324_v19  ;;  %v327_v26 = vsel %vm313_vm0, %v306_v20, -inf }
  0x3e   : > { %396 = vst.msk [vmem:[#allocation2 + $0x80] sm:$0xff] %vm378_vm1, %v3796_v0  ;;  %398 = vst.msk [vmem:[#allocation2 + $0x90] sm:$0xff] %vm378_vm1, %v3796_v0  ;;  %v329_v27 = vsel %vm313_vm0, %v307_v21, -inf  ;;  %v330_v28 = vsel %vm313_vm0, %v308_v22, -inf  ;;  %v309_v29 = vld [vmem:[%s3953_s15 + $0x60] sm:$0xff]  ;;  %v310_v30 = vld [vmem:[%s3953_s15 + $0x68] sm:$0xff]  ;;  %348 = vrot.lane.b32.xlu0 %v319_v23, %s3797_s12  ;;  %v328_v33 = vmax.f32 %v326_v25, %v327_v26 }
  0x3f   : > { %397 = vst.msk [vmem:[#allocation2 + $0x88] sm:$0x3] %vm380_vm2, %v3796_v0  ;;  %399 = vst.msk [vmem:[#allocation2 + $0x98] sm:$0x3] %vm380_vm2, %v3796_v0  ;;  %v311_v31 = vld [vmem:[%s3953_s15 + $0x70] sm:$0xff]  ;;  %v312_v32 = vld [vmem:[%s3953_s15 + $0x78] sm:$0xff]  ;;  %v331_v34 = vmax.f32 %v329_v27, %v330_v28 }
  0x40   : > { %1679 = vst.msk [vmem:[#allocation3] sm:$0xff] %vm313_vm0, %v3796_v0  ;;  %1682 = vst.msk [vmem:[#allocation3 + $0x10] sm:$0xff] %vm313_vm0, %v3796_v0  ;;  %352 = vrot.lane.b32.xlu1 %v325_v24, %s3797_s12  ;;  %v332_v35 = vsel %vm313_vm0, %v309_v29, -inf  ;;  %v333_v36 = vsel %vm313_vm0, %v310_v30, -inf  ;;  %v335_v37 = vsel %vm313_vm0, %v311_v31, -inf  ;;  %v336_v38 = vsel %vm313_vm0, %v312_v32, -inf }
  0x41   : > { %1684 = vst.msk [vmem:[#allocation3 + $0x20] sm:$0xff] %vm313_vm0, %v3796_v0  ;;  %1686 = vst.msk [vmem:[#allocation3 + $0x30] sm:$0xff] %vm313_vm0, %v3796_v0  ;;  %v334_v39 = vmax.f32 %v332_v35, %v333_v36  ;;  %v337_v40 = vmax.f32 %v335_v37, %v336_v38  ;;  %v417_v41 = vld [vmem:[#allocation2 + $0x1] sm:$0xff]  ;;  %s3800_s23 = smov 8   ;;  %s3801_s29 = smov 28   ;;  %vm838_vm3 = vcmask 1043456  }
  0x42   : > { %1688 = vst.msk [vmem:[#allocation3 + $0x40] sm:$0xff] %vm313_vm0, %v3796_v0  ;;  %1690 = vst.msk [vmem:[#allocation3 + $0x50] sm:$0xff] %vm313_vm0, %v3796_v0  ;;  %354 = vrot.lane.b32.xlu0 %v328_v33, %s3797_s12  ;;  %v425_v43 = vld [vmem:[#allocation2 + $0x2] sm:$0xff]  ;;  %s3802_s19 = smov 12   ;;  %s3803_s21 = smov 16   ;;  %v811_v9 = vld [vmem:[%s5168_s1 + $0x18] sm:$0xff] }
  0x43   : > { %1692 = vst.msk [vmem:[#allocation3 + $0x60] sm:$0xff] %vm313_vm0, %v3796_v0  ;;  %1694 = vst.msk [vmem:[#allocation3 + $0x70] sm:$0xff] %vm313_vm0, %v3796_v0  ;;  %s3804_s9 = smov 20   ;;  %v812_v5 = vld [vmem:[%s5168_s1 + $0x20] sm:$0xf]  ;;  %v4102_v11 = vand.u32 4294901760, %v811_v9 }
  0x44   : > { %1696 = vst.msk [vmem:[#allocation3 + $0x80] sm:$0xff] %vm313_vm0, %v3796_v0  ;;  %1698 = vst.msk [vmem:[#allocation3 + $0x90] sm:$0xff] %vm313_vm0, %v3796_v0  ;;  %356 = vrot.lane.b32.xlu1 %v331_v34, %s3797_s12  ;;  %v840_v6 = vsel %vm838_vm3, %v812_v5, 0  ;;  %v810_v12 = vld [vmem:[%s5168_s1 + $0x10] sm:$0xff]  ;;  %s3805_s15 = smov 32   ;;  %vm754_vm4 = vcmask 97280  }
  0x45   : > { %v465_v42 = vld [vmem:[#allocation2 + $0x90] sm:$0xff]  ;;  %v4090_v8 = vand.u32 4294901760, %v840_v6  ;;  %v4115_v15 = vsub.f32 %v811_v9, %v4102_v11  ;;  %v4122_v16 = vand.u32 4294901760, %v810_v12  ;;  %vm763_vm5 = vcmask 130048   ;;  %s3808_s8 = smov 40   ;;  %s3809_s16 = smov 64  }
  0x46   : > { %358 = vrot.lane.b32.xlu0 %v334_v39, %s3797_s12  ;;  %v473_v44 = vld [vmem:[#allocation2 + $0x91] sm:$0xff]  ;;  %vm772_vm6 = vcmask 162816   ;;  %vm781_vm7 = vcmask 195584   ;;  %vm790_vm8 = vcmask 228352   ;;  %vm799_vm9 = vcmask 261120   ;;  %s3143_s11 = sshll.u32 %s3873_s28, 10 }
  0x47   : > { %3324 = vmatprep.subr.mxu0 %v4090_v8  ;;  %v4132_v20 = vand.u32 4294901760, %v4115_v15  ;;  %v4138_v22 = vsub.f32 %v810_v12, %v4122_v16  ;;  %vm813_vm10 = vcmask 293888   ;;  %vm1680_vm11 = vcmask 58368   ;;  %s3038_s28 = scalar_lea.sflag [#allocation6], %s3949_s17  ;;  %p5183_p12 = scmp.ne.s32.totalorder %s5179_s13, 0 }
  0x48   : > { %360 = vrot.lane.b32.xlu1 %v337_v40, %s3797_s12  ;;  %3325 = vmatpush3.msra.mxu0 %v4090_v8  ;;  %1685 = vst.msk [vmem:[#allocation3 + $0x28] sm:$0x3] %vm1680_vm11, %v3796_v0  ;;  %1681 = vst.msk [vmem:[#allocation3 + $0x8] sm:$0x3] %vm1680_vm11, %v3796_v0  ;;  %vm2070_vm12 = vcmask 326656   ;;  %vm2079_vm13 = vcmask 392192   ;;  %s5117_s12 = scalar_lea.hbm %s5174_s7, %s3143_s11 }
  0x49   : > { %3326 = vmatprep.subr.mxu0 %v4102_v11  ;;  %v1025_v25 = vsub.f32 %v4115_v15, %v4132_v20  ;;  %v4157_v28 = vand.u32 4294901760, %v4138_v22  ;;  %1683 = vst.msk [vmem:[#allocation3 + $0x18] sm:$0x3] %vm1680_vm11, %v3796_v0  ;;  %1687 = vst.msk [vmem:[#allocation3 + $0x38] sm:$0x3] %vm1680_vm11, %v3796_v0  ;;  %vm2088_vm14 = vcmask 457728  }
  0x4a   : > { %490 = vrot.lane.b32.xlu0 %v417_v41, %s3798_s20  ;;  %3327 = vmatpush3.msra.mxu0 %v4102_v11  ;;  %1689 = vst.msk [vmem:[#allocation3 + $0x48] sm:$0x3] %vm1680_vm11, %v3796_v0  ;;  %1691 = vst.msk [vmem:[#allocation3 + $0x58] sm:$0x3] %vm1680_vm11, %v3796_v0  ;;  %vm2097_vm15 = vcmask 523264  }
  0x4b   : > { %3328 = vmatprep.subr.mxu0 %v4122_v16  ;;  %v1026_v29 = vand.u32 4294901760, %v1025_v25  ;;  %v1032_v32 = vsub.f32 %v4138_v22, %v4157_v28  ;;  %1693 = vst.msk [vmem:[#allocation3 + $0x68] sm:$0x3] %vm1680_vm11, %v3796_v0  ;;  %1695 = vst.msk [vmem:[#allocation3 + $0x78] sm:$0x3] %vm1680_vm11, %v3796_v0 }
  0x4c   : > { %664 = vrot.lane.b32.xlu1 %v465_v42, %s3799_s22  ;;  %3329 = vmatpush3.msra.mxu0 %v4122_v16  ;;  %1697 = vst.msk [vmem:[#allocation3 + $0x88] sm:$0x3] %vm1680_vm11, %v3796_v0  ;;  %1699 = vst.msk [vmem:[#allocation3 + $0x98] sm:$0x3] %vm1680_vm11, %v3796_v0 }
  0x4d   : > { %v1033_v35 = vand.u32 4294901760, %v1032_v32 }
  0x4e   : > { %522 = vrot.lane.b32.xlu0 %v425_v43, %s3800_s23 }
  0x50   : > { %696 = vrot.lane.b32.xlu1 %v473_v44, %s3801_s29 }
  0xac   : > { %v347_v45 = vpop.permute.xlu0 %346 }
  0xad   : > { %v370_v46 = vmax.f32 %v316_v10, %v347_v45  ;;  %v4100_v10 = vsub.f32 %v840_v6, %v4090_v8 }
  0xae   : > { %v351_v47 = vpop.permute.xlu1 %350 }
  0xaf   : > { %v372_v48 = vmax.f32 %v322_v17, %v351_v47  ;;  %401 = vst.msk [vmem:[#allocation2 + $0x11] sm:$0xff] %vm378_vm1, %v370_v46  ;;  %v4112_v14 = vand.u32 4294901760, %v4100_v10  ;;  %v809_v17 = vld [vmem:[%s5168_s1 + $0x8] sm:$0xff] }
  0xb0   : > { %v349_v49 = vpop.permute.xlu0 %348  ;;  %v4134_v21 = vand.u32 4294901760, %v809_v17 }
  0xb1   : > { %403 = vst.msk [vmem:[#allocation2 + $0x31] sm:$0xff] %vm378_vm1, %v372_v48  ;;  %v371_v50 = vmax.f32 %v319_v23, %v349_v49  ;;  %v1018_v19 = vsub.f32 %v4100_v10, %v4112_v14  ;;  %v808_v23 = vld [vmem:[%s5168_s1] sm:$0xff] }
  0xb2   : > { %v353_v51 = vpop.permute.xlu1 %352  ;;  %v4147_v26 = vsub.f32 %v809_v17, %v4134_v21  ;;  %v4149_v27 = vand.u32 4294901760, %v808_v23  ;;  %3330 = vmatprep.subr.mxu0 %v4134_v21 }
  0xb3   : > { %v373_v52 = vmax.f32 %v325_v24, %v353_v51  ;;  %402 = vst.msk [vmem:[#allocation2 + $0x21] sm:$0xff] %vm378_vm1, %v371_v50  ;;  %v1019_v24 = vand.u32 4294901760, %v1018_v19  ;;  %3331 = vmatpush3.msra.mxu0 %v4134_v21 }
  0xb4   : > { %v355_v53 = vpop.permute.xlu0 %354  ;;  %v4160_v30 = vand.u32 4294901760, %v4147_v26  ;;  %v4163_v31 = vsub.f32 %v808_v23, %v4149_v27  ;;  %3332 = vmatprep.subr.mxu0 %v4149_v27 }
  0xb5   : > { %404 = vst.msk [vmem:[#allocation2 + $0x41] sm:$0xff] %vm378_vm1, %v373_v52  ;;  %v374_v54 = vmax.f32 %v328_v33, %v355_v53  ;;  %3346 = vmatprep.subr.mxu1 %v1019_v24  ;;  %3333 = vmatpush3.msra.mxu0 %v4149_v27 }
  0xb6   : > { %v357_v55 = vpop.permute.xlu1 %356  ;;  %v4059_v56 = vld [vmem:[#allocation2 + $0x10] sm:$0xff]  ;;  %3347 = vmatpush3.msra.mxu1 %v1019_v24  ;;  %v1039_v33 = vsub.f32 %v4147_v26, %v4160_v30  ;;  %3368 = vmatprep.subr.mxu0 %v4100_v10  ;;  %v409_v24 = vld [vmem:[#allocation2] sm:$0xff] }
  0xb7   : > { %v418_v57 = vld [vmem:[#allocation2 + $0x11] sm:$0xff]  ;;  %v375_v58 = vmax.f32 %v331_v34, %v357_v55  ;;  %554 = vrot.lane.b32.xlu0 %v4059_v56, %s3802_s19  ;;  %405 = vst.msk [vmem:[#allocation2 + $0x51] sm:$0xff] %vm378_vm1, %v374_v54  ;;  %3348 = vmatprep.subr.mxu1 %v1026_v29  ;;  %v4172_v34 = vand.u32 4294901760, %v4163_v31 }
  0xb8   : > { %492 = vrot.lane.b32.xlu1 %v418_v57, %s3798_s20  ;;  %v359_v59 = vpop.permute.xlu0 %358  ;;  %v426_v62 = vld [vmem:[#allocation2 + $0x12] sm:$0xff]  ;;  %3349 = vmatpush3.msra.mxu1 %v1026_v29  ;;  %v1040_v36 = vand.u32 4294901760, %v1039_v33 }
  0xb9   : > { %406 = vst.msk [vmem:[#allocation2 + $0x61] sm:$0xff] %vm378_vm1, %v375_v58  ;;  %v376_v60 = vmax.f32 %v334_v39, %v359_v59  ;;  %v4075_v3 = vld [vmem:[#allocation2 + $0x31] sm:$0xff]  ;;  %v1046_v37 = vsub.f32 %v4163_v31, %v4172_v34  ;;  %3350 = vmatprep.subr.mxu1 %v1033_v35 }
  0xba   : > { %v361_v61 = vpop.permute.xlu1 %360  ;;  %v442_v1 = vld [vmem:[#allocation2 + $0x21] sm:$0xff]  ;;  %v4088_v7 = vld [vmem:[#allocation2 + $0x32] sm:$0xff]  ;;  %3351 = vmatpush3.msra.mxu1 %v1033_v35 }
  0xbb   : > { %v377_v63 = vmax.f32 %v337_v40, %v361_v61  ;;  %586 = vrot.lane.b32.xlu0 %v418_v57, %s3803_s21  ;;  %407 = vst.msk [vmem:[#allocation2 + $0x71] sm:$0xff] %vm378_vm1, %v376_v60  ;;  %v4069_v2 = vld [vmem:[#allocation2 + $0x20] sm:$0xff]  ;;  %v4109_v13 = vld [vmem:[#allocation2 + $0x30] sm:$0xff]  ;;  %v1047_v39 = vand.u32 4294901760, %v1046_v37  ;;  %3352 = vmatprep.subr.mxu1 %v1040_v36 }
  0xbc   : > { %524 = vrot.lane.b32.xlu1 %v426_v62, %s3800_s23  ;;  %v4080_v4 = vld [vmem:[#allocation2 + $0x22] sm:$0xff]  ;;  %3353 = vmatpush3.msra.mxu1 %v1040_v36  ;;  %v491_v53 = vpop.permute.xlu0 %490  ;;  %v481_v58 = vld [vmem:[#allocation2 + $0x92] sm:$0xff] }
  0xbd   : > { %408 = vst.msk [vmem:[#allocation2 + $0x81] sm:$0xff] %vm378_vm1, %v377_v63  ;;  %v4127_v18 = vld [vmem:[#allocation2 + $0x40] sm:$0xff]  ;;  %3354 = vmatprep.subr.mxu1 %v1047_v39  ;;  %v738_v25 = vsel %vm378_vm1, %v409_v24, %v491_v53 }
  0xbe   : > { %v421_v38 = vld [vmem:[#allocation2 + $0x41] sm:$0xff]  ;;  %v422_v40 = vld [vmem:[#allocation2 + $0x51] sm:$0xff]  ;;  %3355 = vmatpush3.msra.mxu1 %v1047_v39  ;;  %v4234_v52 = vpop.permute.xlu1 %664 }
  0xbf   : > { %588 = vrot.lane.b32.xlu0 %v442_v1, %s3803_s21  ;;  %3390 = vmatprep.subr.mxu1 %v4090_v8  ;;  %v452_v41 = vld [vmem:[#allocation2 + $0x42] sm:$0xff]  ;;  %v430_v42 = vld [vmem:[#allocation2 + $0x52] sm:$0xff] }
  0xc0   : > { %556 = vrot.lane.b32.xlu1 %v4069_v2, %s3802_s19  ;;  %v4197_v43 = vld [vmem:[#allocation2 + $0x50] sm:$0xff]  ;;  %v4203_v44 = vld [vmem:[#allocation2 + $0x60] sm:$0xff]  ;;  %v523_v55 = vpop.permute.xlu0 %522 }
  0xc1   : > { %v423_v45 = vld [vmem:[#allocation2 + $0x61] sm:$0xff]  ;;  %v746_v33 = vsel %vm313_vm0, %v738_v25, %v523_v55 }
  0xc2   : > { %v424_v46 = vld [vmem:[#allocation2 + $0x71] sm:$0xff]  ;;  %v454_v47 = vld [vmem:[#allocation2 + $0x62] sm:$0xff]  ;;  %v4240_v54 = vpop.permute.xlu1 %696 }
  0xc3   : > { %496 = vrot.lane.b32.xlu0 %v4075_v3, %s3798_s20  ;;  %v432_v48 = vld [vmem:[#allocation2 + $0x72] sm:$0xff] }
  0xc4   : > { %494 = vrot.lane.b32.xlu1 %v442_v1, %s3798_s20  ;;  %v4221_v49 = vld [vmem:[#allocation2 + $0x70] sm:$0xff]  ;;  %v440_v50 = vld [vmem:[#allocation2 + $0x80] sm:$0xff] }
  0xc5   : > { %v448_v51 = vld [vmem:[#allocation2 + $0x81] sm:$0xff] }
  0xc6   : > { %v456_v57 = vld [vmem:[#allocation2 + $0x82] sm:$0xff] }
  0xc7   : > { %620 = vrot.lane.b32.xlu0 %v4080_v4, %s3804_s9 }
  0xc8   : > { %618 = vrot.lane.b32.xlu1 %v426_v62, %s3804_s9 }
  0xcb   : > { %528 = vrot.lane.b32.xlu0 %v4088_v7, %s3800_s23 }
  0xcc   : > { %526 = vrot.lane.b32.xlu1 %v4080_v4, %s3800_s23 }
  0xcf   : > { %652 = vrot.lane.b32.xlu0 %v4109_v13, %s3799_s22 }
  0xd0   : > { %650 = vrot.lane.b32.xlu1 %v4069_v2, %s3799_s22 }
  0xd3   : > { %560 = vrot.lane.b32.xlu0 %v4127_v18, %s3802_s19 }
  0xd4   : > { %558 = vrot.lane.b32.xlu1 %v4109_v13, %s3802_s19 }
  0xd7   : > { %684 = vrot.lane.b32.xlu0 %v4075_v3, %s3801_s29 }
  0xd8   : > { %682 = vrot.lane.b32.xlu1 %v442_v1, %s3801_s29 }
  0xdb   : > { %498 = vrot.lane.b32.xlu0 %v421_v38, %s3798_s20 }
  0xdc   : > { %590 = vrot.lane.b32.xlu1 %v4075_v3, %s3803_s21 }
  0xdf   : > { %622 = vrot.lane.b32.xlu0 %v4088_v7, %s3804_s9 }
  0xe0   : > { %714 = vrot.lane.b32.xlu1 %v4080_v4, %s3805_s15 }
  0xe3   : > { %500 = vrot.lane.b32.xlu0 %v422_v40, %s3798_s20 }
  0xe4   : > { %592 = vrot.lane.b32.xlu1 %v421_v38, %s3803_s21 }
  0xe7   : > { %624 = vrot.lane.b32.xlu0 %v452_v41, %s3804_s9 }
  0xe8   : > { %716 = vrot.lane.b32.xlu1 %v4088_v7, %s3805_s15 }
  0xeb   : > { %532 = vrot.lane.b32.xlu0 %v430_v42, %s3800_s23 }
  0xec   : > { %530 = vrot.lane.b32.xlu1 %v452_v41, %s3800_s23 }
  0xef   : > { %656 = vrot.lane.b32.xlu0 %v4197_v43, %s3799_s22 }
  0xf0   : > { %654 = vrot.lane.b32.xlu1 %v4127_v18, %s3799_s22 }
  0xf3   : > { %564 = vrot.lane.b32.xlu0 %v4203_v44, %s3802_s19 }
  0xf4   : > { %562 = vrot.lane.b32.xlu1 %v4197_v43, %s3802_s19 }
  0xf7   : > { %688 = vrot.lane.b32.xlu0 %v422_v40, %s3801_s29 }
  0xf8   : > { %686 = vrot.lane.b32.xlu1 %v421_v38, %s3801_s29 }
  0xfb   : > { %502 = vrot.lane.b32.xlu0 %v423_v45, %s3798_s20 }
  0xfc   : > { %594 = vrot.lane.b32.xlu1 %v422_v40, %s3803_s21 }
  0xff   : > { %626 = vrot.lane.b32.xlu0 %v430_v42, %s3804_s9 }
 0x100   : > { %718 = vrot.lane.b32.xlu1 %v452_v41, %s3805_s15 }
 0x103   : > { %504 = vrot.lane.b32.xlu0 %v424_v46, %s3798_s20  ;;  %s3806_s20 = smov 48  }
 0x104   : > { %596 = vrot.lane.b32.xlu1 %v423_v45, %s3803_s21 }
 0x107   : > { %628 = vrot.lane.b32.xlu0 %v454_v47, %s3804_s9 }
 0x108   : > { %720 = vrot.lane.b32.xlu1 %v430_v42, %s3805_s15 }
 0x10b   : > { %536 = vrot.lane.b32.xlu0 %v432_v48, %s3800_s23 }
 0x10c   : > { %534 = vrot.lane.b32.xlu1 %v454_v47, %s3800_s23 }
 0x10f   : > { %660 = vrot.lane.b32.xlu0 %v4221_v49, %s3799_s22 }
 0x110   : > { %658 = vrot.lane.b32.xlu1 %v4203_v44, %s3799_s22 }
 0x113   : > { %568 = vrot.lane.b32.xlu0 %v440_v50, %s3802_s19 }
 0x114   : > { %566 = vrot.lane.b32.xlu1 %v4221_v49, %s3802_s19 }
 0x117   : > { %692 = vrot.lane.b32.xlu0 %v424_v46, %s3801_s29 }
 0x118   : > { %690 = vrot.lane.b32.xlu1 %v423_v45, %s3801_s29 }
 0x11b   : > { %600 = vrot.lane.b32.xlu0 %v448_v51, %s3803_s21 }
 0x11c   : > { %598 = vrot.lane.b32.xlu1 %v424_v46, %s3803_s21 }
 0x11f   : > { %724 = vrot.lane.b32.xlu0 %v432_v48, %s3805_s15 }
 0x120   : > { %722 = vrot.lane.b32.xlu1 %v454_v47, %s3805_s15 }
 0x123   : > { %662 = vrot.lane.b32.xlu0 %v440_v50, %s3799_s22 }
 0x124   : > { %630 = vrot.lane.b32.xlu1 %v432_v48, %s3804_s9 }
 0x127   : > { %694 = vrot.lane.b32.xlu0 %v448_v51, %s3801_s29  ;;  %s3807_s29 = smov 56  }
 0x128   : > { %632 = vrot.lane.b32.xlu1 %v456_v57, %s3804_s9 }
 0x129   : > { %v555_v60 = vpop.permute.xlu0 %554 }
 0x12a   : > { %v493_v59 = vpop.permute.xlu1 %492  ;;  %v755_v35 = vsel %vm754_vm4, %v746_v33, %v555_v60 }
 0x12b   : > { %726 = vrot.lane.b32.xlu0 %v456_v57, %s3805_s15  ;;  %v739_v41 = vsel %vm378_vm1, %v4059_v56, %v493_v59 }
 0x12c   : > { %728 = vrot.lane.b32.xlu1 %v481_v58, %s3805_s15 }
 0x12d   : > { %v587_v62 = vpop.permute.xlu0 %586 }
 0x12e   : > { %v525_v61 = vpop.permute.xlu1 %524  ;;  %v764_v38 = vsel %vm763_vm5, %v755_v35, %v587_v62 }
 0x12f   : > { %v747_v47 = vsel %vm313_vm0, %v739_v41, %v525_v61 }
 0x131   : > { %v589_v1 = vpop.permute.xlu0 %588 }
 0x132   : > { %v557_v63 = vpop.permute.xlu1 %556 }
 0x133   : > { %v756_v50 = vsel %vm754_vm4, %v747_v47, %v557_v63 }
 0x134   : > { %v765_v56 = vsel %vm763_vm5, %v756_v50, %v589_v1 }
 0x135   : > { %v4248_v4 = vpop.permute.xlu0 %496 }
 0x136   : > { %v4246_v3 = vpop.permute.xlu1 %494 }
 0x139   : > { %v621_v6 = vpop.permute.xlu0 %620 }
 0x13a   : > { %v619_v5 = vpop.permute.xlu1 %618  ;;  %v774_v59 = vsel %vm772_vm6, %v765_v56, %v621_v6 }
 0x13b   : > { %v773_v39 = vsel %vm772_vm6, %v764_v38, %v619_v5 }
 0x13d   : > { %v4252_v9 = vpop.permute.xlu0 %528 }
 0x13e   : > { %v4250_v7 = vpop.permute.xlu1 %526 }
 0x141   : > { %v653_v17 = vpop.permute.xlu0 %652 }
 0x142   : > { %v651_v12 = vpop.permute.xlu1 %650  ;;  %v783_v60 = vsel %vm781_vm7, %v774_v59, %v653_v17 }
 0x143   : > { %v782_v40 = vsel %vm781_vm7, %v773_v39, %v651_v12 }
 0x145   : > { %v4256_v23 = vpop.permute.xlu0 %560 }
 0x146   : > { %v4254_v19 = vpop.permute.xlu1 %558 }
 0x149   : > { %v685_v32 = vpop.permute.xlu0 %684 }
 0x14a   : > { %v683_v29 = vpop.permute.xlu1 %682  ;;  %v792_v62 = vsel %vm790_vm8, %v783_v60, %v685_v32 }
 0x14b   : > { %v791_v42 = vsel %vm790_vm8, %v782_v40, %v683_v29 }
 0x14d   : > { %v4263_v37 = vpop.permute.xlu0 %498 }
 0x14e   : > { %v4261_v36 = vpop.permute.xlu1 %590 }
 0x151   : > { %v623_v46 = vpop.permute.xlu0 %622 }
 0x152   : > { %v715_v45 = vpop.permute.xlu1 %714 }
 0x153   : > { %v800_v48 = vsel %vm799_vm9, %v791_v42, %v715_v45 }
 0x154   : > { %v815_v51 = vsel %vm813_vm10, %v800_v48, 0  ;;  %v740_v48 = vsel %vm378_vm1, %v4069_v2, %v4246_v3 }
 0x155   : > { %v4275_v53 = vand.u32 4294901760, %v815_v51  ;;  %v4279_v57 = vpop.permute.xlu0 %500 }
 0x156   : > { %v4277_v55 = vpop.permute.xlu1 %592 }
 0x157   : > { %v4283_v58 = vsub.f32 %v815_v51, %v4275_v53  ;;  %3356 = vmatprep.mubr.f32.mxu1 %v4275_v53 }
 0x159   : > { %v914_v61 = vand.u32 4294901760, %v4283_v58  ;;  %v4290_v5 = vpop.permute.xlu0 %624 }
 0x15a   : > { %v717_v63 = vpop.permute.xlu1 %716 }
 0x15b   : > { %v801_v12 = vsel %vm799_vm9, %v792_v62, %v717_v63  ;;  %v915_v1 = vsub.f32 %v4283_v58, %v914_v61 }
 0x15c   : > { %v818_v24 = vsel %vm813_vm10, %v801_v12, 0 }
 0x15d   : > { %v4297_v25 = vand.u32 4294901760, %v818_v24  ;;  %v916_v6 = vand.u32 4294901760, %v915_v1  ;;  %v4301_v17 = vpop.permute.xlu0 %532 }
 0x15e   : > { %v4299_v29 = vpop.permute.xlu1 %530 }
 0x15f   : > { %v4304_v32 = vsub.f32 %v818_v24, %v4297_v25  ;;  %3334 = vmatprep.mubr.f32.mxu0 %v916_v6  ;;  %3357 = vmatmul.mubr.f32.vlgmr.msra.gmra.mxu1 %v4297_v25 }
 0x160   : > { %3391 = vmatpush3.msra.mxu1 %v4090_v8 }
 0x161   : > { %v924_v33 = vand.u32 4294901760, %v4304_v32  ;;  %3392 = vmatprep.subr.mxu1 %v4102_v11  ;;  %v657_v38 = vpop.permute.xlu0 %656 }
 0x162   : > { %v655_v35 = vpop.permute.xlu1 %654  ;;  %3393 = vmatpush3.msra.mxu1 %v4102_v11 }
 0x163   : > { %v925_v39 = vsub.f32 %v4304_v32, %v924_v33  ;;  %3394 = vmatprep.subr.mxu1 %v4122_v16 }
 0x164   : > { %3395 = vmatpush3.msra.mxu1 %v4122_v16 }
 0x165   : > { %v926_v40 = vand.u32 4294901760, %v925_v39  ;;  %3396 = vmatprep.subr.mxu1 %v4134_v21  ;;  %v4319_v42 = vpop.permute.xlu0 %564 }
 0x166   : > { %v4317_v41 = vpop.permute.xlu1 %562  ;;  %3397 = vmatpush3.msra.mxu1 %v4134_v21 }
 0x167   : > { %3335 = vmatmul.mubr.f32.vlgmr.msra.gmra.mxu0 %v926_v40  ;;  %3398 = vmatprep.subr.mxu1 %v4149_v27 }
 0x168   : > { %3369 = vmatpush3.msra.mxu0 %v4100_v10  ;;  %3399 = vmatpush3.msra.mxu1 %v4149_v27  ;;  %v748_v10 = vsel %vm313_vm0, %v740_v48, %v4250_v7 }
 0x169   : > { %3370 = vmatprep.subr.mxu0 %v4115_v15  ;;  %3434 = vmatprep.subr.mxu1 %v4090_v8  ;;  %v689_v47 = vpop.permute.xlu0 %688  ;;  %v757_v50 = vsel %vm754_vm4, %v748_v10, %v4254_v19 }
 0x16a   : > { %v687_v45 = vpop.permute.xlu1 %686  ;;  %3371 = vmatpush3.msra.mxu0 %v4115_v15  ;;  %v766_v15 = vsel %vm763_vm5, %v757_v50, %v4261_v36 }
 0x16b   : > { %3372 = vmatprep.subr.mxu0 %v4138_v22  ;;  %v775_v2 = vsel %vm772_vm6, %v766_v15, %v623_v46 }
 0x16c   : > { %3373 = vmatpush3.msra.mxu0 %v4138_v22  ;;  %v784_v22 = vsel %vm781_vm7, %v775_v2, %v655_v35 }
 0x16d   : > { %3374 = vmatprep.subr.mxu0 %v4147_v26  ;;  %v4338_v56 = vpop.permute.xlu0 %502  ;;  %v793_v3 = vsel %vm790_vm8, %v784_v22, %v687_v45 }
 0x16e   : > { %v595_v51 = vpop.permute.xlu1 %594  ;;  %3375 = vmatpush3.msra.mxu0 %v4147_v26  ;;  %v741_v26 = vsel %vm378_vm1, %v4109_v13, %v4248_v4 }
 0x16f   : > { %3376 = vmatprep.subr.mxu0 %v4163_v31  ;;  %v749_v46 = vsel %vm313_vm0, %v741_v26, %v4252_v9  ;;  %v742_v26 = vsel %vm378_vm1, %v4127_v18, %v4263_v37 }
 0x170   : > { %3377 = vmatpush3.msra.mxu0 %v4163_v31  ;;  %v758_v60 = vsel %vm754_vm4, %v749_v46, %v4256_v23  ;;  %v750_v46 = vsel %vm313_vm0, %v742_v26, %v4299_v29 }
 0x171   : > { %3412 = vmatprep.subr.mxu0 %v4112_v14  ;;  %v627_v19 = vpop.permute.xlu0 %626  ;;  %v767_v12 = vsel %vm763_vm5, %v758_v60, %v4277_v55 }
 0x172   : > { %v719_v7 = vpop.permute.xlu1 %718  ;;  %v776_v13 = vsel %vm772_vm6, %v767_v12, %v4290_v5  ;;  %v759_v12 = vsel %vm754_vm4, %v750_v46, %v4317_v41 }
 0x173   : > { %v802_v59 = vsel %vm799_vm9, %v793_v3, %v719_v7  ;;  %v785_v4 = vsel %vm781_vm7, %v776_v13, %v657_v38  ;;  %v768_v18 = vsel %vm763_vm5, %v759_v12, %v595_v51 }
 0x174   : > { %v821_v36 = vsel %vm813_vm10, %v802_v59, 0  ;;  %v794_v24 = vsel %vm790_vm8, %v785_v4, %v689_v47 }
 0x175   : > { %v4356_v31 = vand.u32 4294901760, %v821_v36  ;;  %v505_v63 = vpop.permute.xlu0 %504 }
 0x176   : > { %v597_v62 = vpop.permute.xlu1 %596 }
 0x177   : > { %v4363_v1 = vsub.f32 %v821_v36, %v4356_v31  ;;  %3359 = vmatprep.mubr.f32.mxu1 %v4356_v31  ;;  %v743_v36 = vsel %vm378_vm1, %v4197_v43, %v4279_v57  ;;  %v777_v43 = vsel %vm772_vm6, %v768_v18, %v627_v19 }
 0x178   : > { %v751_v60 = vsel %vm313_vm0, %v743_v36, %v4301_v17 }
 0x179   : > { %v934_v9 = vand.u32 4294901760, %v4363_v1  ;;  %v629_v6 = vpop.permute.xlu0 %628  ;;  %v760_v13 = vsel %vm754_vm4, %v751_v60, %v4319_v42 }
 0x17a   : > { %v721_v23 = vpop.permute.xlu1 %720  ;;  %v769_v37 = vsel %vm763_vm5, %v760_v13, %v597_v62 }
 0x17b   : > { %v803_v35 = vsel %vm799_vm9, %v794_v24, %v721_v23  ;;  %v935_v55 = vsub.f32 %v4363_v1, %v934_v9  ;;  %v778_v57 = vsel %vm772_vm6, %v769_v37, %v629_v6 }
 0x17c   : > { %v824_v39 = vsel %vm813_vm10, %v803_v35, 0 }
 0x17d   : > { %v4376_v40 = vand.u32 4294901760, %v824_v39  ;;  %v936_v45 = vand.u32 4294901760, %v935_v55  ;;  %v537_v48 = vpop.permute.xlu0 %536 }
 0x17e   : > { %v535_v5 = vpop.permute.xlu1 %534 }
 0x17f   : > { %v4379_v38 = vsub.f32 %v824_v39, %v4376_v40  ;;  %3337 = vmatprep.mubr.f32.mxu0 %v936_v45  ;;  %3360 = vmatmul.mubr.f32.gmra.mxu1 %v4376_v40  ;;  %v744_v45 = vsel %vm378_vm1, %v4203_v44, %v4338_v56 }
 0x181   : > { %v944_v47 = vand.u32 4294901760, %v4379_v38  ;;  %v661_v50 = vpop.permute.xlu0 %660 }
 0x182   : > { %v659_v10 = vpop.permute.xlu1 %658  ;;  %v787_v17 = vsel %vm781_vm7, %v778_v57, %v661_v50 }
 0x183   : > { %v945_v15 = vsub.f32 %v4379_v38, %v944_v47  ;;  %v786_v29 = vsel %vm781_vm7, %v777_v43, %v659_v10 }
 0x185   : > { %v946_v2 = vand.u32 4294901760, %v945_v15  ;;  %v569_v3 = vpop.permute.xlu0 %568  ;;  %v745_v15 = vsel %vm378_vm1, %v4221_v49, %v505_v63  ;;  %vm2115_vm1 = vcmask 588800  }
 0x186   : > { %v567_v22 = vpop.permute.xlu1 %566  ;;  %v753_v26 = vsel %vm313_vm0, %v745_v15, %v537_v48 }
 0x187   : > { %3338 = vmatmul.mubr.f32.gmra.mxu0 %v946_v2  ;;  %v752_v2 = vsel %vm313_vm0, %v744_v45, %v535_v5  ;;  %v762_v44 = vsel %vm754_vm4, %v753_v26, %v569_v3 }
 0x188   : > { %v761_v36 = vsel %vm754_vm4, %v752_v2, %v567_v22 }
 0x189   : > { %v693_v59 = vpop.permute.xlu0 %692 }
 0x18a   : > { %v691_v7 = vpop.permute.xlu1 %690  ;;  %v796_v41 = vsel %vm790_vm8, %v787_v17, %v693_v59 }
 0x18b   : > { %v795_v23 = vsel %vm790_vm8, %v786_v29, %v691_v7 }
 0x18d   : > { %v601_v24 = vpop.permute.xlu0 %600 }
 0x18e   : > { %v599_v4 = vpop.permute.xlu1 %598  ;;  %v771_v5 = vsel %vm763_vm5, %v762_v44, %v601_v24 }
 0x18f   : > { %v770_v49 = vsel %vm763_vm5, %v761_v36, %v599_v4 }
 0x191   : > { %v725_v42 = vpop.permute.xlu0 %724 }
 0x192   : > { %v723_v35 = vpop.permute.xlu1 %722  ;;  %v805_v51 = vsel %vm799_vm9, %v796_v41, %v725_v42 }
 0x193   : > { %v804_v55 = vsel %vm799_vm9, %v795_v23, %v723_v35  ;;  %v830_v19 = vsel %vm813_vm10, %v805_v51, 0 }
 0x194   : > { %v827_v62 = vsel %vm813_vm10, %v804_v55, 0  ;;  %v4414_v6 = vand.u32 4294901760, %v830_v19 }
 0x195   : > { %v4412_v39 = vand.u32 4294901760, %v827_v62  ;;  %v663_v50 = vpop.permute.xlu0 %662 }
 0x196   : > { %v631_v10 = vpop.permute.xlu1 %630  ;;  %v4426_v59 = vsub.f32 %v830_v19, %v4414_v6 }
 0x197   : > { %v4423_v7 = vsub.f32 %v827_v62, %v4412_v39  ;;  %3362 = vmatprep.mubr.f32.mxu1 %v4412_v39  ;;  %v779_v46 = vsel %vm772_vm6, %v770_v49, %v631_v10 }
 0x198   : > { %3363 = vmatmul.mubr.f32.gmra.mxu1 %v4414_v6  ;;  %v964_v63 = vand.u32 4294901760, %v4426_v59  ;;  %v788_v4 = vsel %vm781_vm7, %v779_v46, %v663_v50 }
 0x199   : > { %v954_v56 = vand.u32 4294901760, %v4423_v7  ;;  %v695_v12 = vpop.permute.xlu0 %694 }
 0x19a   : > { %v633_v60 = vpop.permute.xlu1 %632  ;;  %v965_v13 = vsub.f32 %v4426_v59, %v964_v63  ;;  %v797_v43 = vsel %vm790_vm8, %v788_v4, %v695_v12 }
 0x19b   : > { %v780_v48 = vsel %vm772_vm6, %v771_v5, %v633_v60  ;;  %v955_v22 = vsub.f32 %v4423_v7, %v954_v56 }
 0x19c   : > { %v789_v3 = vsel %vm781_vm7, %v780_v48, %v4234_v52  ;;  %v966_v24 = vand.u32 4294901760, %v965_v13 }
 0x19d   : > { %v798_v18 = vsel %vm790_vm8, %v789_v3, %v4240_v54  ;;  %v956_v37 = vand.u32 4294901760, %v955_v22  ;;  %v727_v29 = vpop.permute.xlu0 %726 }
 0x19e   : > { %v729_v57 = vpop.permute.xlu1 %728  ;;  %v806_v23 = vsel %vm799_vm9, %v797_v43, %v727_v29 }
 0x19f   : > { %v807_v17 = vsel %vm799_vm9, %v798_v18, %v729_v57  ;;  %3340 = vmatprep.mubr.f32.mxu0 %v956_v37  ;;  %v833_v52 = vsel %vm813_vm10, %v806_v23, 0 }
 0x1a0   : > { %v836_v41 = vsel %vm813_vm10, %v807_v17, 0  ;;  %3341 = vmatmul.mubr.f32.gmra.mxu0 %v966_v24  ;;  %v972_v42 = vand.u32 4294901760, %v833_v52 }
 0x1a1   : > { %v982_v35 = vand.u32 4294901760, %v836_v41 }
 0x1a2   : > { %v973_v54 = vsub.f32 %v833_v52, %v972_v42  ;;  %3365 = vmatprep.mubr.f32.mxu1 %v972_v42 }
 0x1a3   : > { %v983_v55 = vsub.f32 %v836_v41, %v982_v35  ;;  %3366 = vmatmul.mubr.f32.gmra.mxu1 %v982_v35 }
 0x1a4   : > { %3400 = vmatprep.mubr.f32.mxu1 %v914_v61  ;;  %v974_v51 = vand.u32 4294901760, %v973_v54 }
 0x1a5   : > { %v984_v62 = vand.u32 4294901760, %v983_v55 }
 0x1a6   : > { %v975_v19 = vsub.f32 %v973_v54, %v974_v51 }
 0x1a7   : > { %v985_v45 = vsub.f32 %v983_v55, %v984_v62  ;;  %3401 = vmatmul.mubr.f32.vlgmr.msra.gmra.mxu1 %v924_v33 }
 0x1a8   : > { %3403 = vmatprep.mubr.f32.mxu1 %v934_v9  ;;  %v976_v10 = vand.u32 4294901760, %v975_v19  ;;  %3435 = vmatpush3.msra.mxu1 %v4090_v8  ;;  %v1717_v8 = vld [vmem:[#allocation3 + $0x1] sm:$0xff] }
 0x1a9   : > { %v986_v50 = vand.u32 4294901760, %v985_v45  ;;  %3436 = vmatprep.subr.mxu1 %v4102_v11  ;;  %1790 = vrot.lane.b32.xlu0 %v1717_v8, %s3800_s23 }
 0x1aa   : > { %3343 = vmatprep.mubr.f32.mxu0 %v976_v10  ;;  %3437 = vmatpush3.msra.mxu1 %v4102_v11  ;;  %v1765_v11 = vld [vmem:[#allocation3 + $0x90] sm:$0xff]  ;;  %v4519_v10 = vld [vmem:[%s5170_s3] ss:$0 sm:$0xff] }
 0x1ab   : > { %3344 = vmatmul.mubr.f32.gmra.mxu0 %v986_v50  ;;  %3404 = vmatmul.mubr.f32.gmra.mxu1 %v944_v47 }
 0x1ac   : > { %3378 = vmatprep.mubr.f32.mxu0 %v4283_v58  ;;  %3406 = vmatprep.mubr.f32.mxu1 %v954_v56 }
 0x1ad   : > { %3438 = vmatprep.subr.mxu1 %v4122_v16  ;;  %1964 = vrot.lane.b32.xlu1 %v1765_v11, %s3806_s20 }
 0x1ae   : > { %3439 = vmatpush3.msra.mxu1 %v4122_v16  ;;  %v1773_v16 = vld [vmem:[#allocation3 + $0x91] sm:$0xff] }
 0x1af   : > { %3379 = vmatmul.mubr.f32.vlgmr.msra.gmra.mxu0 %v4304_v32  ;;  %3407 = vmatmul.mubr.f32.gmra.mxu1 %v964_v63 }
 0x1b0   : > { %3413 = vmatpush3.msra.mxu0 %v4112_v14  ;;  %3381 = vmatprep.mubr.f32.mxu0 %v4363_v1  ;;  %v1725_v14 = vld [vmem:[#allocation3 + $0x2] sm:$0xff] }
 0x1b1   : > { %3409 = vmatprep.mubr.f32.mxu1 %v974_v51  ;;  %3414 = vmatprep.subr.mxu0 %v4132_v20 }
 0x1b2   : > { %3415 = vmatpush3.msra.mxu0 %v4132_v20  ;;  %3440 = vmatprep.subr.mxu1 %v4134_v21 }
 0x1b3   : > { %3382 = vmatmul.mubr.f32.gmra.mxu0 %v4379_v38  ;;  %3410 = vmatmul.mubr.f32.gmra.mxu1 %v984_v62 }
 0x1b4   : > { %3384 = vmatprep.mubr.f32.mxu0 %v4423_v7  ;;  %3441 = vmatpush3.msra.mxu1 %v4134_v21 }
 0x1b5   : > { %3444 = vmatprep.mubr.f32.mxu1 %v4275_v53  ;;  %3416 = vmatprep.subr.mxu0 %v4157_v28 }
 0x1b6   : > { %3442 = vmatprep.subr.mxu1 %v4149_v27  ;;  %3417 = vmatpush3.msra.mxu0 %v4157_v28 }
 0x1b7   : > { %3443 = vmatpush3.msra.mxu1 %v4149_v27  ;;  %3385 = vmatmul.mubr.f32.gmra.mxu0 %v4426_v59 }
 0x1b8   : > { %3445 = vmatmul.mubr.f32.vlgmr.msra.gmra.mxu1 %v4297_v25  ;;  %3387 = vmatprep.mubr.f32.mxu0 %v973_v54 }
 0x1b9   : > { %3418 = vmatprep.subr.mxu0 %v4160_v30  ;;  %3447 = vmatprep.mubr.f32.mxu1 %v4356_v31 }
 0x1ba   : > { %3419 = vmatpush3.msra.mxu0 %v4160_v30  ;;  %1822 = vrot.lane.b32.xlu0 %v1725_v14, %s3803_s21 }
 0x1bb   : > { %3388 = vmatmul.mubr.f32.gmra.mxu0 %v983_v55  ;;  %3420 = vmatprep.subr.mxu0 %v4172_v34 }
 0x1bc   : > { %3448 = vmatmul.mubr.f32.gmra.mxu1 %v4376_v40  ;;  %3421 = vmatpush3.msra.mxu0 %v4172_v34 }
 0x1bd   : > { %3422 = vmatprep.mubr.f32.mxu0 %v4275_v53  ;;  %3450 = vmatprep.mubr.f32.mxu1 %v4412_v39 }
 0x1be   : > { %1996 = vrot.lane.b32.xlu1 %v1773_v16, %s3807_s29 }
 0x1bf   : > { %3423 = vmatmul.mubr.f32.vlgmr.msra.gmra.mxu0 %v4297_v25 }
 0x1c0   : > { %3451 = vmatmul.mubr.f32.gmra.mxu1 %v4414_v6  ;;  %3425 = vmatprep.mubr.f32.mxu0 %v4356_v31 }
 0x1c1   : > { %3453 = vmatprep.mubr.f32.mxu1 %v972_v42 }
 0x1c3   : > { %3426 = vmatmul.mubr.f32.gmra.mxu0 %v4376_v40 }
 0x1c4   : > { %3454 = vmatmul.mubr.f32.gmra.mxu1 %v982_v35  ;;  %3428 = vmatprep.mubr.f32.mxu0 %v4412_v39 }
 0x1c7   : > { %3429 = vmatmul.mubr.f32.gmra.mxu0 %v4414_v6 }
 0x1c8   : > { %3431 = vmatprep.mubr.f32.mxu0 %v972_v42 }
 0x1cb   : > { %3432 = vmatmul.mubr.f32.gmra.mxu0 %v982_v35  ;;  %v4514_v35 = vld [vmem:[%s5169_s2] ss:$0 sm:$0xff] }
 0x21f   : > { %v3358_v20 = vpop.f32.mrf.mxu1 }
 0x221   : > { %v1084_v21 = vpop.f32.mrf.mxu1 }
 0x227   : > { %v3336_v28 = vpop.f32.mrf.mxu0 }
 0x228   : > { %v1091_v56 = vadd.f32 %v3358_v20, %v3336_v28 }
 0x229   : > { %v918_v0 = vpop.f32.mrf.mxu0 }
 0x22a   : > { %v1085_v46 = vadd.f32 %v1084_v21, %v918_v0 }
 0x23f   : > { %v3361_v27 = vpop.f32.mrf.mxu1 }
 0x241   : > { %v1096_v30 = vpop.f32.mrf.mxu1 }
 0x247   : > { %v3339_v53 = vpop.f32.mrf.mxu0 }
 0x248   : > { %v1103_v22 = vadd.f32 %v3361_v27, %v3339_v53 }
 0x249   : > { %v938_v61 = vpop.f32.mrf.mxu0 }
 0x24a   : > { %v1097_v18 = vadd.f32 %v1096_v30, %v938_v61 }
 0x258   : > { %v3364_v34 = vpop.f32.mrf.mxu1 }
 0x25a   : > { %v1108_v58 = vpop.f32.mrf.mxu1 }
 0x260   : > { %v3342_v32 = vpop.f32.mrf.mxu0 }
 0x261   : > { %v1115_v41 = vadd.f32 %v3364_v34, %v3342_v32 }
 0x262   : > { %v958_v1 = vpop.f32.mrf.mxu0 }
 0x263   : > { %v3367_v25 = vpop.f32.mrf.mxu1  ;;  %v1109_v52 = vadd.f32 %v1108_v58, %v958_v1 }
 0x265   : > { %v1120_v33 = vpop.f32.mrf.mxu1 }
 0x267   : > { %v3402_v31 = vpop.f32.mrf.mxu1 }
 0x269   : > { %v1335_v9 = vpop.f32.mrf.mxu1 }
 0x26b   : > { %v3345_v40 = vpop.f32.mrf.mxu0  ;;  %v3405_v38 = vpop.f32.mrf.mxu1 }
 0x26c   : > { %v1127_v62 = vadd.f32 %v3367_v25, %v3345_v40 }
 0x26d   : > { %v978_v47 = vpop.f32.mrf.mxu0  ;;  %v1351_v39 = vpop.f32.mrf.mxu1 }
 0x26e   : > { %v1121_v21 = vadd.f32 %v1120_v33, %v978_v47 }
 0x26f   : > { %v3380_v6 = vpop.f32.mrf.mxu0  ;;  %v3408_v15 = vpop.f32.mrf.mxu1 }
 0x270   : > { %v1216_v60 = vadd.f32 %v3380_v6, %v1091_v56 }
 0x271   : > { %v1208_v2 = vpop.f32.mrf.mxu0  ;;  %v1367_v7 = vpop.f32.mrf.mxu1 }
 0x272   : > { %v1209_v13 = vadd.f32 %v1208_v2, %v1085_v46  ;;  %v1344_v24 = vadd.f32 %v3402_v31, %v1216_v60 }
 0x273   : > { %v3383_v59 = vpop.f32.mrf.mxu0  ;;  %v3411_v26 = vpop.f32.mrf.mxu1 }
 0x274   : > { %v1230_v37 = vadd.f32 %v3383_v59, %v1103_v22  ;;  %v1336_v23 = vadd.f32 %v1335_v9, %v1209_v13 }
 0x275   : > { %v1222_v36 = vpop.f32.mrf.mxu0  ;;  %v4509_v44 = vpop.f32.mrf.mxu1 }
 0x276   : > { %v1223_v29 = vadd.f32 %v1222_v36, %v1097_v18  ;;  %v1360_v51 = vadd.f32 %v3405_v38, %v1230_v37 }
 0x277   : > { %v3386_v49 = vpop.f32.mrf.mxu0 }
 0x278   : > { %v3446_v63 = vpop.f32.mrf.mxu1  ;;  %v1244_v19 = vadd.f32 %v3386_v49, %v1115_v41  ;;  %v1352_v20 = vadd.f32 %v1351_v39, %v1223_v29 }
 0x279   : > { %v1236_v5 = vpop.f32.mrf.mxu0 }
 0x27a   : > { %v1595_v12 = vpop.f32.mrf.mxu1  ;;  %v1237_v45 = vadd.f32 %v1236_v5, %v1109_v52  ;;  %v1376_v25 = vadd.f32 %v3408_v15, %v1244_v19 }
 0x27b   : > { %v3389_v48 = vpop.f32.mrf.mxu0 }
 0x27c   : > { %v3449_v3 = vpop.f32.mrf.mxu1  ;;  %v1258_v27 = vadd.f32 %v3389_v48, %v1127_v62  ;;  %v1368_v31 = vadd.f32 %v1367_v7, %v1237_v45  ;;  %v2113_v62 = vld [vmem:[%s5171_s4 + $0x38] sm:$0xff] }
 0x27d   : > { %v1250_v4 = vpop.f32.mrf.mxu0 }
 0x27e   : > { %v1607_v43 = vpop.f32.mrf.mxu1  ;;  %v1251_v58 = vadd.f32 %v1250_v4, %v1121_v21  ;;  %v1392_v39 = vadd.f32 %v3411_v26, %v1258_v27  ;;  %v2111_v21 = vld [vmem:[%s5171_s4 + $0x28] sm:$0xff] }
 0x27f   : > { %v3424_v57 = vpop.f32.mrf.mxu0 }
 0x280   : > { %v1484_v17 = vadd.f32 %v3424_v57, %v1344_v24  ;;  %v3452_v50 = vpop.f32.mrf.mxu1  ;;  %v1384_v56 = vadd.f32 %v4509_v44, %v1251_v58 }
 0x281   : > { %v1477_v42 = vpop.f32.mrf.mxu0 }
 0x282   : > { %v1602_v55 = vadd.f32 %v3446_v63, %v1484_v17  ;;  %v1478_v54 = vadd.f32 %v1477_v42, %v1336_v23  ;;  %v1619_v61 = vpop.f32.mrf.mxu1 }
 0x283   : > { %v3427_v8 = vpop.f32.mrf.mxu0 }
 0x284   : > { %v1649_v11 = vmul.f32 %v4514_v35, %v1602_v55  ;;  %v1596_v14 = vadd.f32 %v1595_v12, %v1478_v54  ;;  %v1496_v16 = vadd.f32 %v3427_v8, %v1360_v51  ;;  %v3455_v15 = vpop.f32.mrf.mxu1  ;;  %v2112_v8 = vld [vmem:[%s5171_s4 + $0x30] sm:$0xff] }
 0x285   : > { %v1489_v28 = vpop.f32.mrf.mxu0 }
 0x286   : > { %v1664_v30 = vadd.f32 %v4519_v10, %v1649_v11  ;;  %v1648_v0 = vmul.f32 %v4514_v35, %v1596_v14  ;;  %v1614_v34 = vadd.f32 %v3449_v3, %v1496_v16  ;;  %v1490_v53 = vadd.f32 %v1489_v28, %v1352_v20  ;;  %v1631_v4 = vpop.f32.mrf.mxu1 }
 0x287   : > { %v3430_v32 = vpop.f32.mrf.mxu0  ;;  %v4582_v11 = vand.u32 4294901760, %v2112_v8 }
 0x288   : > { %v1672_v1 = vmax.f32 %v1664_v30, 0.0  ;;  %v1663_v9 = vadd.f32 %v4519_v10, %v1648_v0  ;;  %v1651_v40 = vmul.f32 %v4514_v35, %v1614_v34  ;;  %v1608_v38 = vadd.f32 %v1607_v43, %v1490_v53  ;;  %v2110_v53 = vld [vmem:[%s5171_s4 + $0x20] sm:$0xff] }
 0x289   : > { %v1508_v33 = vadd.f32 %v3430_v32, %v1376_v25  ;;  %v1501_v47 = vpop.f32.mrf.mxu0  ;;  %v4592_v20 = vsub.f32 %v2112_v8, %v4582_v11  ;;  %v4605_v0 = vand.u32 4294901760, %v2111_v21  ;;  %v4622_v32 = vand.u32 4294901760, %v2110_v53 }
 0x28a   : > { %1702 = vst.msk [vmem:[#allocation3 + $0x21] sm:$0xff] %vm313_vm0, %v1672_v1  ;;  %v1671_v6 = vmax.f32 %v1663_v9, 0.0  ;;  %v1666_v2 = vadd.f32 %v4519_v10, %v1651_v40  ;;  %v1650_v59 = vmul.f32 %v4514_v35, %v1608_v38  ;;  %v1502_v36 = vadd.f32 %v1501_v47, %v1368_v31  ;;  %v2109_v1 = vld [vmem:[%s5171_s4 + $0x18] sm:$0xff] }
 0x28b   : > { %v1626_v49 = vadd.f32 %v3452_v50, %v1508_v33  ;;  %v3433_v7 = vpop.f32.mrf.mxu0  ;;  %v4572_v50 = vand.u32 4294901760, %v2113_v62  ;;  %v4612_v34 = vand.u32 4294901760, %v4592_v20  ;;  %v4620_v25 = vsub.f32 %v2111_v21, %v4605_v0 }
 0x28c   : > { %1701 = vst.msk [vmem:[#allocation3 + $0x11] sm:$0xff] %vm313_vm0, %v1671_v6  ;;  %v1674_v63 = vmax.f32 %v1666_v2, 0.0  ;;  %v1665_v5 = vadd.f32 %v4519_v10, %v1650_v59  ;;  %v1620_v46 = vadd.f32 %v1619_v61, %v1502_v36  ;;  %v1520_v26 = vadd.f32 %v3433_v7, %v1392_v39  ;;  %v2108_v39 = vld [vmem:[%s5171_s4 + $0x10] sm:$0xff] }
 0x28d   : > { %v1653_v60 = vmul.f32 %v4514_v35, %v1626_v49  ;;  %v1513_v12 = vpop.f32.mrf.mxu0  ;;  %v4588_v16 = vsub.f32 %v2113_v62, %v4572_v50  ;;  %v2326_v31 = vsub.f32 %v4592_v20, %v4612_v34  ;;  %v4634_v38 = vand.u32 4294901760, %v4620_v25  ;;  %v2107_v49 = vld [vmem:[%s5171_s4 + $0x8] sm:$0xff] }
 0x28e   : > { %1704 = vst.msk [vmem:[#allocation3 + $0x41] sm:$0xff] %vm313_vm0, %v1674_v63  ;;  %v1673_v48 = vmax.f32 %v1665_v5, 0.0  ;;  %v1652_v22 = vmul.f32 %v4514_v35, %v1620_v46  ;;  %v1638_v13 = vadd.f32 %v3455_v15, %v1520_v26  ;;  %v1514_v3 = vadd.f32 %v1513_v12, %v1384_v56 }
 0x28f   : > { %v1668_v44 = vadd.f32 %v4519_v10, %v1653_v60  ;;  %v4603_v30 = vand.u32 4294901760, %v4588_v16  ;;  %v4637_v33 = vsub.f32 %v2110_v53, %v4622_v32  ;;  %v4639_v47 = vand.u32 4294901760, %v2109_v1  ;;  %v2106_v60 = vld [vmem:[%s5171_s4] sm:$0xff] }
 0x290   : > { %1703 = vst.msk [vmem:[#allocation3 + $0x31] sm:$0xff] %vm313_vm0, %v1673_v48  ;;  %v1667_v18 = vadd.f32 %v4519_v10, %v1652_v22  ;;  %v1655_v37 = vmul.f32 %v4514_v35, %v1638_v13  ;;  %v1632_v24 = vadd.f32 %v1631_v4, %v1514_v3  ;;  %v4648_v6 = vand.u32 4294901760, %v2108_v39 }
 0x291   : > { %v1676_v43 = vmax.f32 %v1668_v44, 0.0  ;;  %v4539_v57 = vld [vmem:[#allocation3 + $0x20] sm:$0xff]  ;;  %v2319_v61 = vsub.f32 %v4588_v16, %v4603_v30  ;;  %v2327_v2 = vand.u32 4294901760, %v2326_v31  ;;  %v2333_v59 = vsub.f32 %v4620_v25, %v4634_v38 }
 0x292   : > { %v1675_v29 = vmax.f32 %v1667_v18, 0.0  ;;  %v1670_v17 = vadd.f32 %v4519_v10, %v1655_v37  ;;  %v1654_v23 = vmul.f32 %v4514_v35, %v1632_v24  ;;  %1950 = vrot.lane.b32.xlu0 %v4539_v57, %s3806_s20  ;;  %1856 = vrot.lane.b32.xlu1 %v4539_v57, %s3799_s22  ;;  %v1742_v42 = vld [vmem:[#allocation3 + $0x21] sm:$0xff]  ;;  %v4653_v36 = vand.u32 4294901760, %v4637_v33 }
 0x293   : > { %1706 = vst.msk [vmem:[#allocation3 + $0x61] sm:$0xff] %vm313_vm0, %v1676_v43  ;;  %v4550_v55 = vld [vmem:[#allocation3 + $0x10] sm:$0xff]  ;;  %v2114_v35 = vld [vmem:[%s5171_s4 + $0x40] sm:$0xff]  ;;  %v2320_v40 = vand.u32 4294901760, %v2319_v61  ;;  %v4656_v15 = vsub.f32 %v2109_v1, %v4639_v47  ;;  %v4663_v7 = vsub.f32 %v2108_v39, %v4648_v6  ;;  %v4665_v56 = vand.u32 4294901760, %v2107_v49  ;;  %v4781_v1 = vpop.permute.xlu1 %1964 }
 0x294   : > { %1705 = vst.msk [vmem:[#allocation3 + $0x51] sm:$0xff] %vm313_vm0, %v1675_v29  ;;  %v1678_v41 = vmax.f32 %v1670_v17, 0.0  ;;  %v1669_v52 = vadd.f32 %v4519_v10, %v1654_v23  ;;  %v4559_v51 = vand.u32 4294901760, %v2114_v35  ;;  %v4565_v19 = vld [vmem:[#allocation3 + $0x22] sm:$0xff]  ;;  %v4567_v45 = vld [vmem:[#allocation3 + $0x11] sm:$0xff]  ;;  %v2334_v5 = vand.u32 4294901760, %v2333_v59 }
 0x295   : > { %v4598_v27 = vld [vmem:[#allocation3 + $0x12] sm:$0xff]  ;;  %v4631_v9 = vld [vmem:[#allocation3 + $0x41] sm:$0xff]  ;;  %v2340_v46 = vsub.f32 %v4637_v33, %v4653_v36  ;;  %v4673_v26 = vand.u32 4294901760, %v4656_v15  ;;  %v4684_v12 = vand.u32 4294901760, %v4663_v7  ;;  %v4687_v48 = vsub.f32 %v2107_v49, %v4665_v56 }
 0x296   : > { %1708 = vst.msk [vmem:[#allocation3 + $0x81] sm:$0xff] %vm313_vm0, %v1678_v41  ;;  %v1677_v54 = vmax.f32 %v1669_v52, 0.0  ;;  %1888 = vrot.lane.b32.xlu1 %v1742_v42, %s3805_s15  ;;  %1854 = vrot.lane.b32.xlu0 %v4550_v55, %s3799_s22  ;;  %v4570_v10 = vsub.f32 %v2114_v35, %v4559_v51  ;;  %v4668_v63 = vld [vmem:[#allocation3 + $0x42] sm:$0xff]  ;;  %v4689_v22 = vand.u32 4294901760, %v2106_v60  ;;  %v1781_v59 = vld [vmem:[#allocation3 + $0x92] sm:$0xff] }
 0x297   : > { %3456 = vmatprep.subr.mxu0 %v4559_v51  ;;  %v2347_v13 = vsub.f32 %v4656_v15, %v4673_v26  ;;  %v2341_v3 = vand.u32 4294901760, %v2340_v46  ;;  %v4695_v4 = vand.u32 4294901760, %v4687_v48  ;;  %v4701_v18 = vld [vmem:[#allocation3 + $0x30] sm:$0xff]  ;;  %v2354_v37 = vsub.f32 %v4663_v7, %v4684_v12  ;;  %v4729_v35 = vld [vmem:[#allocation3 + $0x40] sm:$0xff]  ;;  %v4791_v39 = vpop.permute.xlu1 %1996 }
 0x298   : > { %1707 = vst.msk [vmem:[#allocation3 + $0x71] sm:$0xff] %vm313_vm0, %v1677_v54  ;;  %v4585_v14 = vand.u32 4294901760, %v4570_v10  ;;  %3457 = vmatpush3.msra.mxu0 %v4559_v51  ;;  %v4698_v44 = vsub.f32 %v2106_v60, %v4689_v22  ;;  %v1720_v17 = vld [vmem:[#allocation3 + $0x31] sm:$0xff] }
 0x299   : > { %3458 = vmatprep.subr.mxu0 %v4572_v50  ;;  %v2348_v24 = vand.u32 4294901760, %v2347_v13  ;;  %v2361_v29 = vsub.f32 %v4687_v48, %v4695_v4  ;;  %v2355_v23 = vand.u32 4294901760, %v2354_v37  ;;  %v1728_v54 = vld [vmem:[#allocation3 + $0x32] sm:$0xff] }
 0x29a   : > { %1920 = vrot.lane.b32.xlu1 %v4565_v19, %s3808_s8  ;;  %1886 = vrot.lane.b32.xlu0 %v4567_v45, %s3805_s15  ;;  %v2312_v28 = vsub.f32 %v4570_v10, %v4585_v14  ;;  %v4711_v43 = vand.u32 4294901760, %v4698_v44  ;;  %v4741_v62 = vld [vmem:[#allocation3 + $0x60] sm:$0xff] }
 0x29b   : > { %3459 = vmatpush3.msra.mxu0 %v4572_v50  ;;  %v2362_v52 = vand.u32 4294901760, %v2361_v29  ;;  %v1722_v8 = vld [vmem:[#allocation3 + $0x51] sm:$0xff] }
 0x29c   : > { %v2313_v58 = vand.u32 4294901760, %v2312_v28  ;;  %3460 = vmatprep.subr.mxu0 %v4582_v11  ;;  %v2368_v41 = vsub.f32 %v4698_v44, %v4711_v43  ;;  %v1730_v21 = vld [vmem:[#allocation3 + $0x52] sm:$0xff] }
 0x29d   : > { %3461 = vmatpush3.msra.mxu0 %v4582_v11  ;;  %v1740_v28 = vld [vmem:[#allocation3 + $0x80] sm:$0xff] }
 0x29e   : > { %1794 = vrot.lane.b32.xlu1 %v1742_v42, %s3800_s23  ;;  %1918 = vrot.lane.b32.xlu0 %v4598_v27, %s3808_s8  ;;  %v1748_v53 = vld [vmem:[#allocation3 + $0x81] sm:$0xff] }
 0x29f   : > { %3486 = vmatprep.subr.mxu1 %v2313_v58  ;;  %3462 = vmatprep.subr.mxu0 %v4605_v0  ;;  %v1756_v61 = vld [vmem:[#allocation3 + $0x82] sm:$0xff]  ;;  %v1732_v31 = vld [vmem:[#allocation3 + $0x72] sm:$0xff] }
 0x2a0   : > { %3487 = vmatpush3.msra.mxu1 %v2313_v58  ;;  %3463 = vmatpush3.msra.mxu0 %v4605_v0  ;;  %v1724_v58 = vld [vmem:[#allocation3 + $0x71] sm:$0xff] }
 0x2a1   : > { %3488 = vmatprep.subr.mxu1 %v2320_v40  ;;  %3464 = vmatprep.subr.mxu0 %v4622_v32 }
 0x2a2   : > { %1982 = vrot.lane.b32.xlu1 %v1742_v42, %s3807_s29  ;;  %1892 = vrot.lane.b32.xlu0 %v4631_v9, %s3805_s15  ;;  %v2369_v42 = vand.u32 4294901760, %v2368_v41 }
 0x2a3   : > { %3489 = vmatpush3.msra.mxu1 %v2320_v40  ;;  %3465 = vmatpush3.msra.mxu0 %v4622_v32  ;;  %v1791_v40 = vpop.permute.xlu0 %1790 }
 0x2a4   : > { %3490 = vmatprep.subr.mxu1 %v2327_v2  ;;  %3466 = vmatprep.subr.mxu0 %v4639_v47 }
 0x2a5   : > { %3491 = vmatpush3.msra.mxu1 %v2327_v2  ;;  %3467 = vmatpush3.msra.mxu0 %v4639_v47 }
 0x2a6   : > { %1826 = vrot.lane.b32.xlu1 %v4565_v19, %s3803_s21  ;;  %1924 = vrot.lane.b32.xlu0 %v4668_v63, %s3808_s8 }
 0x2a7   : > { %3492 = vmatprep.subr.mxu1 %v2334_v5  ;;  %3468 = vmatprep.subr.mxu0 %v4648_v6  ;;  %v1823_v2 = vpop.permute.xlu0 %1822 }
 0x2a8   : > { %3493 = vmatpush3.msra.mxu1 %v2334_v5  ;;  %3469 = vmatpush3.msra.mxu0 %v4648_v6 }
 0x2a9   : > { %3494 = vmatprep.subr.mxu1 %v2341_v3  ;;  %3470 = vmatprep.subr.mxu0 %v4665_v56 }
 0x2aa   : > { %2014 = vrot.lane.b32.xlu1 %v4565_v19, %s3809_s16  ;;  %1952 = vrot.lane.b32.xlu0 %v4701_v18, %s3806_s20  ;;  %v1723_v19 = vld [vmem:[#allocation3 + $0x61] sm:$0xff] }
 0x2ab   : > { %3495 = vmatpush3.msra.mxu1 %v2341_v3  ;;  %3471 = vmatpush3.msra.mxu0 %v4665_v56  ;;  %v1709_v3 = vld [vmem:[#allocation3] sm:$0xff] }
 0x2ac   : > { %3496 = vmatprep.subr.mxu1 %v2348_v24  ;;  %3472 = vmatprep.subr.mxu0 %v4689_v22  ;;  %v2038_v29 = vsel %vm313_vm0, %v1709_v3, %v1791_v40 }
 0x2ad   : > { %3497 = vmatpush3.msra.mxu1 %v2348_v24  ;;  %3473 = vmatpush3.msra.mxu0 %v4689_v22  ;;  %v2046_v41 = vsel %vm763_vm5, %v2038_v29, %v1823_v2 }
 0x2ae   : > { %1796 = vrot.lane.b32.xlu0 %v1720_v17, %s3800_s23  ;;  %1792 = vrot.lane.b32.xlu1 %v4567_v45, %s3800_s23  ;;  %v1754_v45 = vld [vmem:[#allocation3 + $0x62] sm:$0xff] }
 0x2af   : > { %3498 = vmatprep.subr.mxu1 %v2355_v23  ;;  %3516 = vmatprep.subr.mxu0 %v4570_v10 }
 0x2b0   : > { %3499 = vmatpush3.msra.mxu1 %v2355_v23 }
 0x2b1   : > { %3500 = vmatprep.subr.mxu1 %v2362_v52 }
 0x2b2   : > { %1984 = vrot.lane.b32.xlu0 %v1720_v17, %s3807_s29  ;;  %1824 = vrot.lane.b32.xlu1 %v4598_v27, %s3803_s21  ;;  %v4758_v27 = vld [vmem:[#allocation3 + $0x50] sm:$0xff] }
 0x2b3   : > { %3501 = vmatpush3.msra.mxu1 %v2362_v52 }
 0x2b4   : > { %3502 = vmatprep.subr.mxu1 %v2369_v42 }
 0x2b5   : > { %3503 = vmatpush3.msra.mxu1 %v2369_v42 }
 0x2b6   : > { %1828 = vrot.lane.b32.xlu0 %v1728_v54, %s3803_s21  ;;  %1860 = vrot.lane.b32.xlu1 %v4729_v35, %s3799_s22 }
 0x2b7   : > { %3546 = vmatprep.subr.mxu1 %v4559_v51 }
 0x2ba   : > { %2016 = vrot.lane.b32.xlu0 %v1728_v54, %s3809_s16  ;;  %1798 = vrot.lane.b32.xlu1 %v4631_v9, %s3800_s23 }
 0x2be   : > { %1890 = vrot.lane.b32.xlu0 %v1720_v17, %s3805_s15  ;;  %1830 = vrot.lane.b32.xlu1 %v4668_v63, %s3803_s21 }
 0x2c2   : > { %1864 = vrot.lane.b32.xlu0 %v4741_v62, %s3799_s22  ;;  %1954 = vrot.lane.b32.xlu1 %v4729_v35, %s3806_s20 }
 0x2c6   : > { %1802 = vrot.lane.b32.xlu0 %v1723_v19, %s3800_s23  ;;  %1986 = vrot.lane.b32.xlu1 %v4631_v9, %s3807_s29  ;;  %v4783_v9 = vld [vmem:[#allocation3 + $0x70] sm:$0xff] }
 0x2ca   : > { %1928 = vrot.lane.b32.xlu0 %v1754_v45, %s3808_s8  ;;  %2018 = vrot.lane.b32.xlu1 %v4668_v63, %s3809_s16 }
 0x2ce   : > { %1800 = vrot.lane.b32.xlu0 %v1722_v8, %s3800_s23  ;;  %1858 = vrot.lane.b32.xlu1 %v4701_v18, %s3799_s22 }
 0x2d2   : > { %1832 = vrot.lane.b32.xlu0 %v1730_v21, %s3803_s21  ;;  %1922 = vrot.lane.b32.xlu1 %v1728_v54, %s3808_s8 }
 0x2d6   : > { %1956 = vrot.lane.b32.xlu0 %v4758_v27, %s3806_s20  ;;  %1896 = vrot.lane.b32.xlu1 %v1723_v19, %s3805_s15 }
 0x2da   : > { %1988 = vrot.lane.b32.xlu0 %v1722_v8, %s3807_s29  ;;  %1834 = vrot.lane.b32.xlu1 %v1754_v45, %s3803_s21 }
 0x2de   : > { %1926 = vrot.lane.b32.xlu0 %v1730_v21, %s3808_s8  ;;  %1958 = vrot.lane.b32.xlu1 %v4741_v62, %s3806_s20 }
 0x2e2   : > { %1868 = vrot.lane.b32.xlu0 %v1740_v28, %s3799_s22  ;;  %1990 = vrot.lane.b32.xlu1 %v1723_v19, %s3807_s29 }
 0x2e6   : > { %1900 = vrot.lane.b32.xlu0 %v1748_v53, %s3805_s15  ;;  %2022 = vrot.lane.b32.xlu1 %v1754_v45, %s3809_s16 }
 0x2ea   : > { %1962 = vrot.lane.b32.xlu0 %v1740_v28, %s3806_s20  ;;  %1862 = vrot.lane.b32.xlu1 %v4758_v27, %s3799_s22 }
 0x2ee   : > { %1994 = vrot.lane.b32.xlu0 %v1748_v53, %s3807_s29  ;;  %1894 = vrot.lane.b32.xlu1 %v1722_v8, %s3805_s15 }
 0x2f2   : > { %2020 = vrot.lane.b32.xlu1 %v1730_v21, %s3809_s16  ;;  %1804 = vrot.lane.b32.xlu0 %v1724_v58, %s3800_s23 }
 0x2f6   : > { %1932 = vrot.lane.b32.xlu1 %v1756_v61, %s3808_s8  ;;  %1836 = vrot.lane.b32.xlu0 %v1732_v31, %s3803_s21 }
 0x2fa   : > { %1866 = vrot.lane.b32.xlu1 %v4783_v9, %s3799_s22  ;;  %1960 = vrot.lane.b32.xlu0 %v4783_v9, %s3806_s20  ;;  %s3810_s22 = smov [#allocation7]  }
 0x2fb   : > { %s3731_s21 = sshll.u32 %s3810_s22, 4  ;;  %s3732_s21 = int_to_ptr.vmem [resolvable:$false] %s3731_s21 }
 0x2fe   : > { %1898 = vrot.lane.b32.xlu1 %v1724_v58, %s3805_s15  ;;  %1992 = vrot.lane.b32.xlu0 %v1724_v58, %s3807_s29  ;;  %s3132_s29 = sshll.u32 %s3949_s17, 6  ;;  %s3733_s15 = scalar_lea.vmem %s3732_s21, 2048 }
 0x302   : > { %1930 = vrot.lane.b32.xlu1 %v1732_v31, %s3808_s8  ;;  %2024 = vrot.lane.b32.xlu0 %v1732_v31, %s3809_s16  ;;  %s5086_s8 = scalar_lea.vmem [#allocation7], %s3132_s29 }
 0x303   : > { %s3051_s18 = sshll.u32 %s5086_s8, 4  ;;  %s5121_s18 = int_to_ptr.vmem [resolvable:$true] %s3051_s18 }
 0x304   : > { %v1857_v49 = vpop.permute.xlu1 %1856  ;;  %v1951_v63 = vpop.permute.xlu0 %1950  ;;  %p3734_p5 = scmp.lt.s32.totalorder %s5121_s18, %s3732_s21 }
 0x306   : > { %2028 = vrot.lane.b32.xlu1 %v1781_v59, %s3809_s16  ;;  %2026 = vrot.lane.b32.xlu0 %v1756_v61, %s3809_s16  ;;  %s3727_s16 = scalar_lea.vmem %s5121_s18, 1024 }
 0x307   : > { %p3728_p11 = scmp.ne.s32.totalorder %s5121_s18, %s3727_s16  ;;  %p3735_p7 = scmp.lt.s32.totalorder %s3733_s15, %s3727_s16 }
 0x308   : > { %v1889_v5 = vpop.permute.xlu1 %1888  ;;  %v1855_v46 = vpop.permute.xlu0 %1854 }
 0x309   : > { %v2054_v52 = vsel %vm781_vm7, %v2046_v41, %v1855_v46  ;;  %p3729_p13 = pnand %p3728_p11, %p5183_p12  ;;  %p3736_p8 = por %p3735_p7, %p3734_p5 }
 0x30b   : > { %p3730_p4 = pneg %p3729_p13 }
 0x30c   : > { %v1921_v60 = vpop.permute.xlu1 %1920  ;;  %v1887_v13 = vpop.permute.xlu0 %1886 }
 0x30d   : > { %v2062_v42 = vsel %vm799_vm9, %v2054_v52, %v1887_v13  ;;  %p3737_p10 = pnand %p3736_p8, %p3730_p4 }
 0x310   : > { %v4797_v37 = vpop.permute.xlu1 %1794  ;;  %v1919_v24 = vpop.permute.xlu0 %1918 }
 0x311   : > { %v2071_v54 = vsel %vm2070_vm12, %v2062_v42, %v1919_v24 }
 0x312   : > { %v2080_v8 = vsel %vm2079_vm13, %v2071_v54, %v1951_v63 }
 0x314   : > { %v1983_v17 = vpop.permute.xlu1 %1982  ;;  %v1893_v23 = vpop.permute.xlu0 %1892 }
 0x315   : > { %v2089_v21 = vsel %vm2088_vm14, %v2080_v8, %v1983_v17 }
 0x318   : > { %v4804_v19 = vpop.permute.xlu1 %1826  ;;  %v1925_v45 = vpop.permute.xlu0 %1924 }
 0x31c   : > { %v2015_v28 = vpop.permute.xlu1 %2014  ;;  %v1953_v53 = vpop.permute.xlu0 %1952 }
 0x31d   : > { %v2098_v58 = vsel %vm2097_vm15, %v2089_v21, %v2015_v28 }
 0x31e   : > { %v2117_v61 = vsel %vm2115_vm1, %v2098_v58, 0 }
 0x31f   : > { %v4810_v31 = vand.u32 4294901760, %v2117_v61 }
 0x320   : > { %v1793_v40 = vpop.permute.xlu1 %1792  ;;  %v1797_v2 = vpop.permute.xlu0 %1796 }
 0x321   : > { %v4813_v59 = vsub.f32 %v2117_v61, %v4810_v31  ;;  %3504 = vmatprep.mubr.f32.mxu1 %v4810_v31  ;;  %v2039_v46 = vsel %vm313_vm0, %v4550_v55, %v1793_v40  ;;  %v2041_v42 = vsel %vm313_vm0, %v4701_v18, %v1797_v2 }
 0x323   : > { %v2216_v63 = vand.u32 4294901760, %v4813_v59 }
 0x324   : > { %v1825_v13 = vpop.permute.xlu1 %1824  ;;  %v1985_v3 = vpop.permute.xlu0 %1984 }
 0x325   : > { %v2047_v24 = vsel %vm763_vm5, %v2039_v46, %v1825_v13  ;;  %v2217_v29 = vsub.f32 %v4813_v59, %v2216_v63 }
 0x326   : > { %v2055_v17 = vsel %vm781_vm7, %v2047_v24, %v1857_v49 }
 0x327   : > { %v2063_v41 = vsel %vm799_vm9, %v2055_v17, %v1889_v5  ;;  %v2218_v52 = vand.u32 4294901760, %v2217_v29 }
 0x328   : > { %v2072_v54 = vsel %vm2070_vm12, %v2063_v41, %v1921_v60  ;;  %v1861_v8 = vpop.permute.xlu1 %1860  ;;  %v1829_v55 = vpop.permute.xlu0 %1828 }
 0x329   : > { %v2081_v21 = vsel %vm2079_vm13, %v2072_v54, %v1953_v53  ;;  %v2049_v28 = vsel %vm763_vm5, %v2041_v42, %v1829_v55  ;;  %3474 = vmatprep.mubr.f32.mxu0 %v2218_v52 }
 0x32a   : > { %v2057_v58 = vsel %vm781_vm7, %v2049_v28, %v1861_v8  ;;  %v2090_v49 = vsel %vm2088_vm14, %v2081_v21, %v1985_v3 }
 0x32b   : > { %v2065_v61 = vsel %vm799_vm9, %v2057_v58, %v1893_v23 }
 0x32c   : > { %v4833_v5 = vpop.permute.xlu1 %1798  ;;  %v2017_v40 = vpop.permute.xlu0 %2016  ;;  %v4836_v18 = vsel %vm2070_vm12, %v2065_v61, %v1925_v45 }
 0x32d   : > { %v2099_v60 = vsel %vm2097_vm15, %v2090_v49, %v2017_v40 }
 0x32e   : > { %v2120_v2 = vsel %vm2115_vm1, %v2099_v60, 0 }
 0x32f   : > { %v4840_v53 = vand.u32 4294901760, %v2120_v2 }
 0x330   : > { %v4842_v46 = vpop.permute.xlu1 %1830  ;;  %v1891_v13 = vpop.permute.xlu0 %1890 }
 0x331   : > { %v4845_v24 = vsub.f32 %v2120_v2, %v4840_v53  ;;  %3505 = vmatmul.mubr.f32.vlgmr.msra.gmra.mxu1 %v4840_v53 }
 0x332   : > { %3547 = vmatpush3.msra.mxu1 %v4559_v51 }
 0x333   : > { %v2226_v23 = vand.u32 4294901760, %v4845_v24  ;;  %3548 = vmatprep.subr.mxu1 %v4572_v50 }
 0x334   : > { %v1955_v45 = vpop.permute.xlu1 %1954  ;;  %v4851_v3 = vpop.permute.xlu0 %1864  ;;  %3549 = vmatpush3.msra.mxu1 %v4572_v50 }
 0x335   : > { %v2227_v29 = vsub.f32 %v4845_v24, %v2226_v23  ;;  %3550 = vmatprep.subr.mxu1 %v4582_v11 }
 0x336   : > { %3551 = vmatpush3.msra.mxu1 %v4582_v11 }
 0x337   : > { %v2228_v17 = vand.u32 4294901760, %v2227_v29  ;;  %3552 = vmatprep.subr.mxu1 %v4605_v0 }
 0x338   : > { %v1987_v41 = vpop.permute.xlu1 %1986  ;;  %v4860_v52 = vpop.permute.xlu0 %1802  ;;  %3553 = vmatpush3.msra.mxu1 %v4605_v0 }
 0x339   : > { %3475 = vmatmul.mubr.f32.vlgmr.msra.gmra.mxu0 %v2228_v17  ;;  %3554 = vmatprep.subr.mxu1 %v4622_v32 }
 0x33a   : > { %3517 = vmatpush3.msra.mxu0 %v4570_v10  ;;  %3555 = vmatpush3.msra.mxu1 %v4622_v32  ;;  %v2040_v10 = vsel %vm313_vm0, %v4539_v57, %v4797_v37 }
 0x33b   : > { %3518 = vmatprep.subr.mxu0 %v4588_v16  ;;  %3556 = vmatprep.subr.mxu1 %v4639_v47 }
 0x33c   : > { %v2019_v42 = vpop.permute.xlu1 %2018  ;;  %v4868_v54 = vpop.permute.xlu0 %1928  ;;  %3519 = vmatpush3.msra.mxu0 %v4588_v16  ;;  %3557 = vmatpush3.msra.mxu1 %v4639_v47  ;;  %v2048_v16 = vsel %vm763_vm5, %v2040_v10, %v4804_v19 }
 0x33d   : > { %3520 = vmatprep.subr.mxu0 %v4592_v20  ;;  %3558 = vmatprep.subr.mxu1 %v4648_v6 }
 0x33e   : > { %3521 = vmatpush3.msra.mxu0 %v4592_v20  ;;  %3559 = vmatpush3.msra.mxu1 %v4648_v6 }
 0x33f   : > { %3522 = vmatprep.subr.mxu0 %v4620_v25  ;;  %3560 = vmatprep.subr.mxu1 %v4665_v56 }
 0x340   : > { %v1859_v8 = vpop.permute.xlu1 %1858  ;;  %v4883_v55 = vpop.permute.xlu0 %1800  ;;  %3523 = vmatpush3.msra.mxu0 %v4620_v25  ;;  %3561 = vmatpush3.msra.mxu1 %v4665_v56 }
 0x341   : > { %v2056_v20 = vsel %vm781_vm7, %v2048_v16, %v1859_v8  ;;  %3524 = vmatprep.subr.mxu0 %v4637_v33  ;;  %3562 = vmatprep.subr.mxu1 %v4689_v22  ;;  %v2042_v8 = vsel %vm313_vm0, %v4729_v35, %v4833_v5 }
 0x342   : > { %3525 = vmatpush3.msra.mxu0 %v4637_v33  ;;  %3563 = vmatpush3.msra.mxu1 %v4689_v22  ;;  %v2064_v37 = vsel %vm799_vm9, %v2056_v20, %v1891_v13  ;;  %v2050_v20 = vsel %vm763_vm5, %v2042_v8, %v4842_v46 }
 0x343   : > { %3526 = vmatprep.subr.mxu0 %v4656_v15  ;;  %3606 = vmatprep.subr.mxu1 %v4559_v51 }
 0x344   : > { %v1923_v57 = vpop.permute.xlu1 %1922  ;;  %v1833_v25 = vpop.permute.xlu0 %1832  ;;  %3527 = vmatpush3.msra.mxu0 %v4656_v15 }
 0x345   : > { %v2073_v19 = vsel %vm2070_vm12, %v2064_v37, %v1923_v57  ;;  %3528 = vmatprep.subr.mxu0 %v4663_v7 }
 0x346   : > { %v2082_v21 = vsel %vm2079_vm13, %v2073_v19, %v1955_v45  ;;  %3529 = vmatpush3.msra.mxu0 %v4663_v7 }
 0x347   : > { %v2091_v33 = vsel %vm2088_vm14, %v2082_v21, %v1987_v41  ;;  %3530 = vmatprep.subr.mxu0 %v4687_v48 }
 0x348   : > { %v2100_v28 = vsel %vm2097_vm15, %v2091_v33, %v2019_v42  ;;  %v1897_v58 = vpop.permute.xlu1 %1896  ;;  %v1957_v61 = vpop.permute.xlu0 %1956  ;;  %3531 = vmatpush3.msra.mxu0 %v4687_v48 }
 0x349   : > { %v2123_v15 = vsel %vm2115_vm1, %v2100_v28, 0  ;;  %3532 = vmatprep.subr.mxu0 %v4698_v44  ;;  %v2083_v28 = vsel %vm2079_vm13, %v4836_v18, %v1957_v61 }
 0x34a   : > { %v4906_v49 = vand.u32 4294901760, %v2123_v15  ;;  %3533 = vmatpush3.msra.mxu0 %v4698_v44 }
 0x34b   : > { %3576 = vmatprep.subr.mxu0 %v4585_v14 }
 0x34c   : > { %v1835_v7 = vpop.permute.xlu1 %1834  ;;  %3507 = vmatprep.mubr.f32.mxu1 %v4906_v49  ;;  %v1989_v40 = vpop.permute.xlu0 %1988  ;;  %v4912_v60 = vsub.f32 %v2123_v15, %v4906_v49 }
 0x34e   : > { %v2236_v2 = vand.u32 4294901760, %v4912_v60 }
 0x350   : > { %v1959_v48 = vpop.permute.xlu1 %1958  ;;  %v1927_v13 = vpop.permute.xlu0 %1926  ;;  %v2237_v45 = vsub.f32 %v4912_v60, %v2236_v2 }
 0x352   : > { %v2238_v29 = vand.u32 4294901760, %v2237_v45  ;;  %v2092_v45 = vsel %vm2088_vm14, %v2083_v28, %v1989_v40 }
 0x354   : > { %v1991_v17 = vpop.permute.xlu1 %1990  ;;  %3477 = vmatprep.mubr.f32.mxu0 %v2238_v29  ;;  %v1869_v44 = vpop.permute.xlu0 %1868 }
 0x358   : > { %v2023_v41 = vpop.permute.xlu1 %2022  ;;  %v1901_v42 = vpop.permute.xlu0 %1900 }
 0x35c   : > { %v1863_v10 = vpop.permute.xlu1 %1862  ;;  %v1963_v16 = vpop.permute.xlu0 %1962 }
 0x35d   : > { %v2058_v57 = vsel %vm781_vm7, %v2050_v20, %v1863_v10 }
 0x360   : > { %v1895_v37 = vpop.permute.xlu1 %1894  ;;  %v1995_v19 = vpop.permute.xlu0 %1994 }
 0x361   : > { %v2066_v21 = vsel %vm799_vm9, %v2058_v57, %v1895_v37  ;;  %v2043_v37 = vsel %vm313_vm0, %v4758_v27, %v4883_v55 }
 0x362   : > { %v2075_v33 = vsel %vm2070_vm12, %v2066_v21, %v1927_v13 }
 0x363   : > { %v2084_v15 = vsel %vm2079_vm13, %v2075_v33, %v1959_v48 }
 0x364   : > { %v2093_v35 = vsel %vm2088_vm14, %v2084_v15, %v1991_v17  ;;  %v2021_v5 = vpop.permute.xlu1 %2020  ;;  %v1805_v29 = vpop.permute.xlu0 %1804 }
 0x365   : > { %v2101_v46 = vsel %vm2097_vm15, %v2092_v45, %v2021_v5  ;;  %v2102_v10 = vsel %vm2097_vm15, %v2093_v35, %v2023_v41  ;;  %v2045_v18 = vsel %vm313_vm0, %v4783_v9, %v1805_v29  ;;  %v2051_v9 = vsel %vm763_vm5, %v2043_v37, %v1833_v25 }
 0x366   : > { %v2126_v8 = vsel %vm2115_vm1, %v2101_v46, 0  ;;  %v2129_v20 = vsel %vm2115_vm1, %v2102_v10, 0  ;;  %v2059_v55 = vsel %vm781_vm7, %v2051_v9, %v4851_v3 }
 0x367   : > { %v4935_v13 = vand.u32 4294901760, %v2126_v8  ;;  %v4937_v57 = vand.u32 4294901760, %v2129_v20  ;;  %v2067_v25 = vsel %vm799_vm9, %v2059_v55, %v1897_v58 }
 0x368   : > { %v1933_v61 = vpop.permute.xlu1 %1932  ;;  %v1837_v40 = vpop.permute.xlu0 %1836 }
 0x369   : > { %v4942_v48 = vsub.f32 %v2126_v8, %v4935_v13  ;;  %v2053_v17 = vsel %vm763_vm5, %v2045_v18, %v1837_v40  ;;  %3508 = vmatmul.mubr.f32.gmra.mxu1 %v4935_v13  ;;  %v4947_v41 = vsub.f32 %v2129_v20, %v4937_v57  ;;  %v2044_v8 = vsel %vm313_vm0, %v4741_v62, %v4860_v52 }
 0x36a   : > { %3510 = vmatprep.mubr.f32.mxu1 %v4937_v57  ;;  %v2061_v28 = vsel %vm781_vm7, %v2053_v17, %v1869_v44  ;;  %v2052_v20 = vsel %vm763_vm5, %v2044_v8, %v1835_v7  ;;  %v2076_v18 = vsel %vm2070_vm12, %v2067_v25, %v4868_v54 }
 0x36b   : > { %v2246_v21 = vand.u32 4294901760, %v4942_v48  ;;  %v2256_v33 = vand.u32 4294901760, %v4947_v41  ;;  %v2069_v5 = vsel %vm799_vm9, %v2061_v28, %v1901_v42 }
 0x36c   : > { %v1867_v15 = vpop.permute.xlu1 %1866  ;;  %v1961_v45 = vpop.permute.xlu0 %1960  ;;  %v2078_v3 = vsel %vm2070_vm12, %v2069_v5, %v1933_v61 }
 0x36d   : > { %v2247_v35 = vsub.f32 %v4942_v48, %v2246_v21  ;;  %v2257_v27 = vsub.f32 %v4947_v41, %v2256_v33  ;;  %v2060_v58 = vsel %vm781_vm7, %v2052_v20, %v1867_v15  ;;  %v2085_v42 = vsel %vm2079_vm13, %v2076_v18, %v1961_v45 }
 0x36e   : > { %v2087_v54 = vsel %vm2079_vm13, %v2078_v3, %v4781_v1 }
 0x36f   : > { %v2248_v29 = vand.u32 4294901760, %v2247_v35  ;;  %v2258_v46 = vand.u32 4294901760, %v2257_v27  ;;  %v2096_v35 = vsel %vm2088_vm14, %v2087_v54, %v4791_v39 }
 0x370   : > { %v1899_v44 = vpop.permute.xlu1 %1898  ;;  %v1993_v10 = vpop.permute.xlu0 %1992 }
 0x371   : > { %3478 = vmatmul.mubr.f32.gmra.mxu0 %v2248_v29  ;;  %v2068_v40 = vsel %vm799_vm9, %v2060_v58, %v1899_v44  ;;  %v2094_v17 = vsel %vm2088_vm14, %v2085_v42, %v1993_v10 }
 0x372   : > { %3480 = vmatprep.mubr.f32.mxu0 %v2258_v46 }
 0x374   : > { %v1931_v37 = vpop.permute.xlu1 %1930  ;;  %v2025_v9 = vpop.permute.xlu0 %2024 }
 0x375   : > { %v2077_v62 = vsel %vm2070_vm12, %v2068_v40, %v1931_v37  ;;  %v2103_v52 = vsel %vm2097_vm15, %v2094_v17, %v2025_v9 }
 0x376   : > { %v2086_v7 = vsel %vm2079_vm13, %v2077_v62, %v1963_v16  ;;  %v2132_v61 = vsel %vm2115_vm1, %v2103_v52, 0 }
 0x377   : > { %v4984_v28 = vand.u32 4294901760, %v2132_v61  ;;  %v2095_v15 = vsel %vm2088_vm14, %v2086_v7, %v1995_v19 }
 0x378   : > { %v2029_v45 = vpop.permute.xlu1 %2028  ;;  %v2027_v27 = vpop.permute.xlu0 %2026 }
 0x379   : > { %v2265_v55 = vsub.f32 %v2132_v61, %v4984_v28  ;;  %v2105_v25 = vsel %vm2097_vm15, %v2096_v35, %v2029_v45  ;;  %v2104_v5 = vsel %vm2097_vm15, %v2095_v15, %v2027_v27  ;;  %3511 = vmatmul.mubr.f32.gmra.mxu1 %v4984_v28 }
 0x37a   : > { %v2138_v1 = vsel %vm2115_vm1, %v2105_v25, 0  ;;  %v2135_v16 = vsel %vm2115_vm1, %v2104_v5, 0 }
 0x37b   : > { %v4995_v29 = vand.u32 4294901760, %v2138_v1  ;;  %v4997_v19 = vand.u32 4294901760, %v2135_v16  ;;  %v2266_v46 = vand.u32 4294901760, %v2265_v55 }
 0x37d   : > { %v2285_v39 = vsub.f32 %v2138_v1, %v4995_v29  ;;  %v2275_v44 = vsub.f32 %v2135_v16, %v4997_v19  ;;  %3513 = vmatprep.mubr.f32.mxu1 %v4997_v19  ;;  %v2267_v10 = vsub.f32 %v2265_v55, %v2266_v46  ;;  %v5073_v16 = vld [vmem:[%s5172_s5] ss:$0 sm:$0xff] }
 0x37e   : > { %3514 = vmatmul.mubr.f32.gmra.mxu1 %v4995_v29 }
 0x37f   : > { %3564 = vmatprep.mubr.f32.mxu1 %v2216_v63  ;;  %v2268_v8 = vand.u32 4294901760, %v2267_v10  ;;  %v2276_v20 = vand.u32 4294901760, %v2275_v44  ;;  %v2286_v18 = vand.u32 4294901760, %v2285_v39 }
 0x381   : > { %3481 = vmatmul.mubr.f32.gmra.mxu0 %v2268_v8  ;;  %v2277_v3 = vsub.f32 %v2275_v44, %v2276_v20  ;;  %v2287_v58 = vsub.f32 %v2285_v39, %v2286_v18 }
 0x382   : > { %3565 = vmatmul.mubr.f32.vlgmr.msra.gmra.mxu1 %v2226_v23 }
 0x383   : > { %3607 = vmatpush3.msra.mxu1 %v4559_v51  ;;  %3567 = vmatprep.mubr.f32.mxu1 %v2236_v2  ;;  %v2278_v42 = vand.u32 4294901760, %v2277_v3  ;;  %v2288_v40 = vand.u32 4294901760, %v2287_v58 }
 0x384   : > { %3608 = vmatprep.subr.mxu1 %v4572_v50 }
 0x385   : > { %3609 = vmatpush3.msra.mxu1 %v4572_v50  ;;  %3483 = vmatprep.mubr.f32.mxu0 %v2278_v42 }
 0x386   : > { %3610 = vmatprep.subr.mxu1 %v4582_v11  ;;  %3484 = vmatmul.mubr.f32.gmra.mxu0 %v2288_v40 }
 0x387   : > { %3568 = vmatmul.mubr.f32.gmra.mxu1 %v2246_v21  ;;  %3534 = vmatprep.mubr.f32.mxu0 %v4813_v59 }
 0x388   : > { %3611 = vmatpush3.msra.mxu1 %v4582_v11  ;;  %3570 = vmatprep.mubr.f32.mxu1 %v2256_v33 }
 0x389   : > { %3612 = vmatprep.subr.mxu1 %v4605_v0 }
 0x38a   : > { %3613 = vmatpush3.msra.mxu1 %v4605_v0  ;;  %3535 = vmatmul.mubr.f32.vlgmr.msra.gmra.mxu0 %v4845_v24 }
 0x38b   : > { %3614 = vmatprep.subr.mxu1 %v4622_v32  ;;  %3571 = vmatmul.mubr.f32.gmra.mxu1 %v2266_v46 }
 0x38c   : > { %3577 = vmatpush3.msra.mxu0 %v4585_v14  ;;  %3615 = vmatpush3.msra.mxu1 %v4622_v32 }
 0x38d   : > { %3537 = vmatprep.mubr.f32.mxu0 %v4912_v60  ;;  %3573 = vmatprep.mubr.f32.mxu1 %v2276_v20  ;;  %v5078_v20 = vld [vmem:[%s5173_s6] ss:$0 sm:$0xff] }
 0x38e   : > { %3578 = vmatprep.subr.mxu0 %v4603_v30  ;;  %3616 = vmatprep.subr.mxu1 %v4639_v47 }
 0x38f   : > { %3579 = vmatpush3.msra.mxu0 %v4603_v30  ;;  %3617 = vmatpush3.msra.mxu1 %v4639_v47 }
 0x390   : > { %3580 = vmatprep.subr.mxu0 %v4612_v34  ;;  %3618 = vmatprep.subr.mxu1 %v4648_v6 }
 0x391   : > { %3538 = vmatmul.mubr.f32.gmra.mxu0 %v4942_v48  ;;  %3574 = vmatmul.mubr.f32.gmra.mxu1 %v2286_v18 }
 0x392   : > { %3581 = vmatpush3.msra.mxu0 %v4612_v34  ;;  %3619 = vmatpush3.msra.mxu1 %v4648_v6 }
 0x393   : > { %3540 = vmatprep.mubr.f32.mxu0 %v4947_v41  ;;  %3582 = vmatprep.subr.mxu0 %v4634_v38 }
 0x394   : > { %3620 = vmatprep.subr.mxu1 %v4665_v56  ;;  %3624 = vmatprep.mubr.f32.mxu1 %v4810_v31 }
 0x395   : > { %3583 = vmatpush3.msra.mxu0 %v4634_v38  ;;  %3621 = vmatpush3.msra.mxu1 %v4665_v56 }
 0x396   : > { %3584 = vmatprep.subr.mxu0 %v4653_v36  ;;  %3622 = vmatprep.subr.mxu1 %v4689_v22 }
 0x397   : > { %3541 = vmatmul.mubr.f32.gmra.mxu0 %v2265_v55  ;;  %3623 = vmatpush3.msra.mxu1 %v4689_v22 }
 0x398   : > { %3585 = vmatpush3.msra.mxu0 %v4653_v36  ;;  %3543 = vmatprep.mubr.f32.mxu0 %v2275_v44 }
 0x399   : > { %3586 = vmatprep.subr.mxu0 %v4673_v26  ;;  %3625 = vmatmul.mubr.f32.vlgmr.msra.gmra.mxu1 %v4840_v53 }
 0x39a   : > { %3587 = vmatpush3.msra.mxu0 %v4673_v26  ;;  %3627 = vmatprep.mubr.f32.mxu1 %v4906_v49 }
 0x39b   : > { %3588 = vmatprep.subr.mxu0 %v4684_v12  ;;  %3544 = vmatmul.mubr.f32.gmra.mxu0 %v2285_v39 }
 0x39c   : > { %3589 = vmatpush3.msra.mxu0 %v4684_v12  ;;  %3594 = vmatprep.mubr.f32.mxu0 %v4810_v31 }
 0x39d   : > { %3590 = vmatprep.subr.mxu0 %v4695_v4  ;;  %3628 = vmatmul.mubr.f32.gmra.mxu1 %v4935_v13 }
 0x39e   : > { %3591 = vmatpush3.msra.mxu0 %v4695_v4  ;;  %3630 = vmatprep.mubr.f32.mxu1 %v4937_v57 }
 0x39f   : > { %3592 = vmatprep.subr.mxu0 %v4711_v43 }
 0x3a0   : > { %3593 = vmatpush3.msra.mxu0 %v4711_v43 }
 0x3a1   : > { %3595 = vmatmul.mubr.f32.vlgmr.msra.gmra.mxu0 %v4840_v53  ;;  %3631 = vmatmul.mubr.f32.gmra.mxu1 %v4984_v28 }
 0x3a2   : > { %3597 = vmatprep.mubr.f32.mxu0 %v4906_v49  ;;  %3633 = vmatprep.mubr.f32.mxu1 %v4997_v19 }
 0x3a5   : > { %3598 = vmatmul.mubr.f32.gmra.mxu0 %v4935_v13  ;;  %3634 = vmatmul.mubr.f32.gmra.mxu1 %v4995_v29 }
 0x3a6   : > { %3600 = vmatprep.mubr.f32.mxu0 %v4937_v57 }
 0x3a9   : > { %3601 = vmatmul.mubr.f32.gmra.mxu0 %v4984_v28 }
 0x3aa   : > { %3603 = vmatprep.mubr.f32.mxu0 %v4997_v19 }
 0x3ad   : > { %3604 = vmatmul.mubr.f32.gmra.mxu0 %v4995_v29 }
 0x3f1   : > { %v3506_v51 = vpop.f32.mrf.mxu1 }
 0x3f3   : > { %v2406_v50 = vpop.f32.mrf.mxu1 }
 0x3f9   : > { %v3476_v14 = vpop.f32.mrf.mxu0 }
 0x3fa   : > { %v2413_v21 = vadd.f32 %v3506_v51, %v3476_v14 }
 0x3fb   : > { %v2220_v0 = vpop.f32.mrf.mxu0 }
 0x3fc   : > { %v2407_v37 = vadd.f32 %v2406_v50, %v2220_v0 }
 0x429   : > { %v3509_v11 = vpop.f32.mrf.mxu1 }
 0x42b   : > { %v2418_v30 = vpop.f32.mrf.mxu1 }
 0x431   : > { %v3479_v32 = vpop.f32.mrf.mxu0 }
 0x432   : > { %v2425_v54 = vadd.f32 %v3509_v11, %v3479_v32 }
 0x433   : > { %v2240_v6 = vpop.f32.mrf.mxu0 }
 0x434   : > { %v2419_v61 = vadd.f32 %v2418_v30, %v2240_v6 }
 0x439   : > { %v3512_v34 = vpop.f32.mrf.mxu1 }
 0x43b   : > { %v2430_v38 = vpop.f32.mrf.mxu1 }
 0x43e   : > { %v3515_v47 = vpop.f32.mrf.mxu1 }
 0x440   : > { %v2442_v36 = vpop.f32.mrf.mxu1 }
 0x441   : > { %v3482_v56 = vpop.f32.mrf.mxu0 }
 0x442   : > { %v3566_v26 = vpop.f32.mrf.mxu1  ;;  %v2437_v5 = vadd.f32 %v3512_v34, %v3482_v56 }
 0x443   : > { %v2260_v12 = vpop.f32.mrf.mxu0 }
 0x444   : > { %v2669_v22 = vpop.f32.mrf.mxu1  ;;  %v2431_v1 = vadd.f32 %v2430_v38, %v2260_v12 }
 0x446   : > { %v3485_v4 = vpop.f32.mrf.mxu0 }
 0x447   : > { %v3569_v43 = vpop.f32.mrf.mxu1  ;;  %v2449_v44 = vadd.f32 %v3515_v47, %v3485_v4 }
 0x448   : > { %v2280_v31 = vpop.f32.mrf.mxu0 }
 0x449   : > { %v2685_v59 = vpop.f32.mrf.mxu1  ;;  %v2443_v50 = vadd.f32 %v2442_v36, %v2280_v31 }
 0x44a   : > { %v3536_v63 = vpop.f32.mrf.mxu0 }
 0x44b   : > { %v3572_v53 = vpop.f32.mrf.mxu1  ;;  %v2546_v9 = vadd.f32 %v3536_v63, %v2413_v21 }
 0x44c   : > { %v2538_v24 = vpop.f32.mrf.mxu0 }
 0x44d   : > { %v2701_v23 = vpop.f32.mrf.mxu1  ;;  %v2539_v7 = vadd.f32 %v2538_v24, %v2407_v37  ;;  %v2678_v15 = vadd.f32 %v3566_v26, %v2546_v9 }
 0x44f   : > { %v2670_v25 = vadd.f32 %v2669_v22, %v2539_v7 }
 0x451   : > { %v3539_v49 = vpop.f32.mrf.mxu0  ;;  %v3575_v60 = vpop.f32.mrf.mxu1 }
 0x452   : > { %v2560_v28 = vadd.f32 %v3539_v49, %v2425_v54 }
 0x453   : > { %v2552_v2 = vpop.f32.mrf.mxu0  ;;  %v5068_v13 = vpop.f32.mrf.mxu1 }
 0x454   : > { %v2553_v27 = vadd.f32 %v2552_v2, %v2419_v61  ;;  %v2694_v39 = vadd.f32 %v3569_v43, %v2560_v28 }
 0x456   : > { %v2686_v51 = vadd.f32 %v2685_v59, %v2553_v27 }
 0x457   : > { %v3542_v57 = vpop.f32.mrf.mxu0 }
 0x458   : > { %v2574_v10 = vadd.f32 %v3542_v57, %v2437_v5 }
 0x459   : > { %v3626_v48 = vpop.f32.mrf.mxu1  ;;  %v2566_v41 = vpop.f32.mrf.mxu0 }
 0x45a   : > { %v2567_v8 = vadd.f32 %v2566_v41, %v2431_v1  ;;  %v2710_v6 = vadd.f32 %v3572_v53, %v2574_v10 }
 0x45b   : > { %v2945_v33 = vpop.f32.mrf.mxu1  ;;  %v3545_v17 = vpop.f32.mrf.mxu0 }
 0x45c   : > { %v2588_v11 = vadd.f32 %v3545_v17, %v2449_v44  ;;  %v2702_v26 = vadd.f32 %v2701_v23, %v2567_v8 }
 0x45d   : > { %v3629_v62 = vpop.f32.mrf.mxu1  ;;  %v2580_v52 = vpop.f32.mrf.mxu0 }
 0x45e   : > { %v2581_v38 = vadd.f32 %v2580_v52, %v2443_v50  ;;  %v2726_v59 = vadd.f32 %v3575_v60, %v2588_v11 }
 0x45f   : > { %v2957_v45 = vpop.f32.mrf.mxu1 }
 0x461   : > { %v3596_v35 = vpop.f32.mrf.mxu0  ;;  %v3632_v18 = vpop.f32.mrf.mxu1 }
 0x462   : > { %v2830_v55 = vadd.f32 %v3596_v35, %v2678_v15 }
 0x463   : > { %v2823_v29 = vpop.f32.mrf.mxu0  ;;  %v2969_v47 = vpop.f32.mrf.mxu1 }
 0x464   : > { %v2952_v19 = vadd.f32 %v3626_v48, %v2830_v55  ;;  %v2824_v46 = vadd.f32 %v2823_v29, %v2670_v25  ;;  %v2718_v48 = vadd.f32 %v5068_v13, %v2581_v38 }
 0x465   : > { %v3599_v3 = vpop.f32.mrf.mxu0  ;;  %v3635_v49 = vpop.f32.mrf.mxu1 }
 0x466   : > { %v2999_v58 = vmul.f32 %v5073_v16, %v2952_v19  ;;  %v2946_v42 = vadd.f32 %v2945_v33, %v2824_v46  ;;  %v2842_v40 = vadd.f32 %v3599_v3, %v2694_v39 }
 0x467   : > { %v2835_v14 = vpop.f32.mrf.mxu0  ;;  %v2981_v54 = vpop.f32.mrf.mxu1 }
 0x468   : > { %v3014_v30 = vadd.f32 %v5078_v20, %v2999_v58  ;;  %v2998_v0 = vmul.f32 %v5073_v16, %v2946_v42  ;;  %v2964_v34 = vadd.f32 %v3629_v62, %v2842_v40  ;;  %v2836_v32 = vadd.f32 %v2835_v14, %v2686_v51 }
 0x469   : > { %v3602_v56 = vpop.f32.mrf.mxu0 }
 0x46a   : > { %v3022_v12 = vmax.f32 %v3014_v30, 0.0  ;;  %v3013_v22 = vadd.f32 %v5078_v20, %v2998_v0  ;;  %v3001_v4 = vmul.f32 %v5073_v16, %v2964_v34  ;;  %v2958_v43 = vadd.f32 %v2957_v45, %v2836_v32 }
 0x46b   : > { %v2854_v36 = vadd.f32 %v3602_v56, %v2710_v6  ;;  %v2847_v31 = vpop.f32.mrf.mxu0 }
 0x46c   : > { %3030 = vst.msk [vmem:[%s5086_s8 + $0x8] sm:$0xff] %vm313_vm0, %v3022_v12  ;;  %v3021_v63 = vmax.f32 %v3013_v22, 0.0  ;;  %v3016_v53 = vadd.f32 %v5078_v20, %v3001_v4  ;;  %v3000_v24 = vmul.f32 %v5073_v16, %v2958_v43  ;;  %v2848_v23 = vadd.f32 %v2847_v31, %v2702_v26 }
 0x46d   : > { %v2976_v2 = vadd.f32 %v3632_v18, %v2854_v36  ;;  %v3605_v57 = vpop.f32.mrf.mxu0 }
 0x46e   : > { %3029 = vst.msk [vmem:[%s5086_s8] sm:$0xff] %vm313_vm0, %v3021_v63  ;;  %v3024_v60 = vmax.f32 %v3016_v53, 0.0  ;;  %v3015_v41 = vadd.f32 %v5078_v20, %v3000_v24  ;;  %v2970_v21 = vadd.f32 %v2969_v47, %v2848_v23  ;;  %v2866_v33 = vadd.f32 %v3605_v57, %v2726_v59 }
 0x46f   : > { %v3003_v17 = vmul.f32 %v5073_v16, %v2976_v2  ;;  %v2859_v37 = vpop.f32.mrf.mxu0 }
 0x470   : > { %3032 = vst.msk [vmem:[%s5086_s8 + $0x18] sm:$0xff] %vm313_vm0, %v3024_v60  ;;  %v3023_v9 = vmax.f32 %v3015_v41, 0.0  ;;  %v3002_v62 = vmul.f32 %v5073_v16, %v2970_v21  ;;  %v2988_v13 = vadd.f32 %v3635_v49, %v2866_v33  ;;  %v2860_v52 = vadd.f32 %v2859_v37, %v2718_v48 }
 0x471   : > { %v3018_v7 = vadd.f32 %v5078_v20, %v3003_v17 }
 0x472   : > { %3031 = vst.msk [vmem:[%s5086_s8 + $0x10] sm:$0xff] %vm313_vm0, %v3023_v9  ;;  %v3017_v61 = vadd.f32 %v5078_v20, %v3002_v62  ;;  %v3005_v28 = vmul.f32 %v5073_v16, %v2988_v13  ;;  %v2982_v15 = vadd.f32 %v2981_v54, %v2860_v52 }
 0x473   : > { %v3026_v45 = vmax.f32 %v3018_v7, 0.0 }
 0x474   : > { %v3025_v35 = vmax.f32 %v3017_v61, 0.0  ;;  %v3020_v27 = vadd.f32 %v5078_v20, %v3005_v28  ;;  %v3004_v55 = vmul.f32 %v5073_v16, %v2982_v15 }
 0x475   : > { %3034 = vst.msk [vmem:[%s5086_s8 + $0x28] sm:$0xff] %vm313_vm0, %v3026_v45 }
 0x476   : > { %3033 = vst.msk [vmem:[%s5086_s8 + $0x20] sm:$0xff] %vm313_vm0, %v3025_v35  ;;  %v3028_v25 = vmax.f32 %v3020_v27, 0.0  ;;  %v3019_v5 = vadd.f32 %v5078_v20, %v3004_v55 }
 0x478   : > { %3036 = vst.msk [vmem:[%s5086_s8 + $0x38] sm:$0xff] %vm313_vm0, %v3028_v25  ;;  %v3027_v1 = vmax.f32 %v3019_v5, 0.0 }
 0x47a   : > { %3035 = vst.msk [vmem:[%s5086_s8 + $0x30] sm:$0xff] %vm313_vm0, %v3027_v1 }
 0x47b   : > { %3740 = shalt.err (!%p3737_p10)
}
 0x47c   : > { %s3741_s20 = scalar_lea.hbm %s5117_s12, 1024  ;;  %s3745_s11 = scalar_lea.hbm %s5174_s7, 2048 }
 0x47d   : > { %p3742_p0 = scmp.ne.s32.totalorder %s5117_s12, %s3741_s20  ;;  %p3746_p1 = scmp.lt.s32.totalorder %s5117_s12, %s5174_s7 }
 0x47e   : > { %p3747_p3 = scmp.lt.s32.totalorder %s3745_s11, %s3741_s20 }
 0x47f   : > { %p3743_p2 = pnand %p3742_p0, %p5183_p12 }
 0x480   : > { %p3748_p6 = por %p3747_p3, %p3746_p1 }
 0x481   : > { %p3744_p9 = pneg %p3743_p2 }
 0x483   : > { %p3749_p11 = pnand %p3748_p6, %p3744_p9 }
 0x485   : > { %3752 = shalt.err (!%p3749_p11)
}
 0x486   : > { %s3811_s16 = smov 128  }
 0x487   : > { %3638 = dma.vmem_to_hbm [thread:$0]  (%p5183_p12), %s5121_s18, 1024, %s5117_s12, %s3038_s28, %s3811_s16, %s3811_s16, %s3800_s23  }
 0x488 PF: > { %s3066_s22 = sand.u32 1, %s3779_s24   ;;  %p5184_p13 = scmp.ne.s32.totalorder %s5180_s14, 0 }
 0x489   : > { %p5185_p4 = scmp.ge.s32.totalorder %s3791_s27, 2  ;;  %s3067_s21 = scalar_lea.sflag [#allocation6], %s3066_s22 }
 0x48b   : > { %p3645_p5 = pnand %p5185_p4, %p5184_p13 }
 0x48d   : > { %p3646_p7 = pneg %p3645_p5 }
 0x48f   : > { %3774 = dma.done.wait (%p3646_p7), %s3067_s21, 1024  }
 0x490   : > { %3776 = vsyncadd (%p3646_p7), %s3067_s21, 4294966272  ;;  %p20_p8 = scmp.ge.s32.totalorder %s3877_s30, 4   ;;  %s5186_s24 = smov %s3783_s25 }
 0x491   : > { %s5187_s25 = smov %s3787_s26  ;;  %s5188_s26 = smov %s3889_s10 }
 0x492   : > { %s5189_s27 = smov %s3877_s30  ;;  %22 = sbr.rel (!%p20_p8) target bundleno = 5 (0x5), region = 97 }
 0x497   :  { %3072 = vsyncpa [#allocation5], 1 }
 0x498   :  { %3074 = vsyncpa [#allocation5 + $0x1], 1 }
 0x499   :  { %3075 = vsyncpa [#allocation6], 1 }
 0x49a   :  { %3077 = vsyncpa [#allocation6 + $0x1], 1 }

</bundles_post_ra>
